<compile_context>
chip_gen: v7x
topology: tpu7x:2x2x1
jax: 0.10.0
libtpu: 0.0.40
codegen_flags: <defaults>
</compile_context>

<pallas_src>
import math

import jax
import jax.numpy as jnp
from jax import lax
from jax.experimental import pallas as pl
from jax.experimental.pallas import tpu as pltpu

PIANO_KEYS = 88


def _round_up(x, m):
    return ((x + m - 1) // m) * m


# ----------------------------------------------------------------------------
# Fused kernel: all LSTM layers (in-kernel time recurrence) + dense-head epilogue.
# ref layout (inputs, outputs, scratch):
#   x2d        : [T*B, 88]          time-major rows, layer-0 input
#   w_ih_l     : [D_l, 4H]          (l = 0..L-1)
#   w_hh_l     : [H, 4H]
#   b_l        : [1, 4H]            b_ih + b_hh
#   w1, b1     : [H, 128], [1, 128] packed dense_piano(100) | dense_notes(10)
#   w2, b2     : [128, 128], [1,128] packed out_piano(88)   | out_num_notes(1)
#   out        : [T, B, 128]        lane-dense packed head output (time-major)
#   h_n, c_n   : [L, B, H]
#   gx scratch : [T, B, 4H]         precomputed x @ W_ih (+bias) per layer
#   y  scratch : [T, B, H]          hidden-state slab (reused across layers)
# ----------------------------------------------------------------------------
def _make_fused_kernel(num_layers, seq_len, batch, hidden, out_pad):
    L, T, B, H = num_layers, seq_len, batch, hidden

    def kernel(*refs):
        x_ref = refs[0]
        w_ih_refs = refs[1:1 + L]
        w_hh_refs = refs[1 + L:1 + 2 * L]
        b_refs = refs[1 + 2 * L:1 + 3 * L]
        w1_ref, b1_ref, w2_ref, b2_ref = refs[1 + 3 * L:5 + 3 * L]
        out_ref, hn_ref, cn_ref = refs[5 + 3 * L:8 + 3 * L]
        gx_ref, y_ref = refs[8 + 3 * L:]

        # Hoisted once (JAX does not CSE broadcast_in_dim): lane mask selecting
        # the g (tanh) gate columns of the [B, 4H] gate vreg.
        lane = lax.broadcasted_iota(jnp.int32, (B, 4 * H), 1)
        g_mask = (lane >= 2 * H) & (lane < 3 * H)

        unroll = T if T <= 16 else 4

        for layer in range(L):
            w_hh = w_hh_refs[layer][...]                       # [H, 4H]

            # Precompute the input projection for ALL timesteps in one big,
            # MXU-efficient matmul (bias folded in).  Only h @ W_hh remains on
            # the sequential critical path.  The D=88 contraction is absorbed
            # here, so no per-step masked 88-lane loads.
            if layer == 0:
                x2d = x_ref[...]                               # [T*B, 88]
            else:
                x2d = y_ref[...].reshape(T * B, H)             # prev layer slab
            gx = jnp.dot(x2d, w_ih_refs[layer][...],
                         preferred_element_type=jnp.float32) + b_refs[layer][...]
            gx_ref[...] = gx.reshape(T, B, 4 * H)

            def step(t, carry):
                h, c = carry
                gates = gx_ref[t] + jnp.dot(h, w_hh,
                                            preferred_element_type=jnp.float32)
                # Full-width EUP passes + one vsel instead of 4 narrow slices.
                act = jnp.where(g_mask, jnp.tanh(gates), jax.nn.sigmoid(gates))
                i = act[:, 0 * H:1 * H]
                f = act[:, 1 * H:2 * H]
                g = act[:, 2 * H:3 * H]
                o = act[:, 3 * H:4 * H]
                c_new = f * c + i * g
                h_new = o * jnp.tanh(c_new)
                y_ref[t] = h_new
                return h_new, c_new

            # TODO(synk): for large B*H carry h/c in VMEM scratch refs instead of
            # loop carries to bound vreg pressure.
            z = jnp.zeros((B, H), jnp.float32)
            h_fin, c_fin = lax.fori_loop(0, T, step, (z, z), unroll=unroll)
            hn_ref[layer] = h_fin
            cn_ref[layer] = c_fin

        # Dense heads fused as an epilogue on the VMEM-resident hidden slab
        # (no HBM round trip for y).  Output is a lane-dense packed 128 tile:
        #   cols [0:88]  = out_piano, col [88] = out_num_notes.
        y2d = y_ref[...].reshape(T * B, H)
        h1 = jnp.dot(y2d, w1_ref[...], preferred_element_type=jnp.float32) + b1_ref[...]
        h1 = jnp.where(h1 > 0, h1, 0.01 * h1)                  # leaky_relu
        out2d = (jnp.dot(h1, w2_ref[...], preferred_element_type=jnp.float32)
                 + b2_ref[...])
        out_ref[...] = out2d.reshape(T, B, out_pad)

    return kernel


def fused_forward(x2d, w_ih, w_hh, b, w1, b1, w2, b2, *, batch, seq_len):
    L = len(w_ih)
    H = w_hh[0].shape[0]
    T, B = seq_len, batch
    out_pad = w2.shape[1]

    kernel = _make_fused_kernel(L, T, B, H, out_pad)

    raw_bytes = 4 * (x2d.size + T * B * (4 * H + H + out_pad)
                     + sum(w.size for w in w_ih) + sum(w.size for w in w_hh)
                     + sum(v.size for v in b)
                     + w1.size + b1.size + w2.size + b2.size)
    vmem_limit = int(min(max(4 * raw_bytes + (2 << 20), 32 << 20), 64 << 20))

    # TODO(synk): for long sequences / large batches, chunk T with an "arbitrary"
    # grid axis (h/c and gx carried in persistent VMEM scratch) and add a
    # "parallel" batch axis for v7x's two TensorCores; store weights + activation
    # slabs in bf16 on v6e/v7x to halve the VMEM footprint and feed the bf16 MXU.
    return pl.pallas_call(
        kernel,
        out_shape=(jax.ShapeDtypeStruct((T, B, out_pad), jnp.float32),
                   jax.ShapeDtypeStruct((L, B, H), jnp.float32),
                   jax.ShapeDtypeStruct((L, B, H), jnp.float32)),
        scratch_shapes=[pltpu.VMEM((T, B, 4 * H), jnp.float32),
                        pltpu.VMEM((T, B, H), jnp.float32)],
        compiler_params=pltpu.CompilerParams(vmem_limit_bytes=vmem_limit),
    )(x2d, *w_ih, *w_hh, *b, w1, b1, w2, b2)


# ----------------------------------------------------------------------------
# Parameter construction (deterministic, PyTorch-style uniform init).
# ----------------------------------------------------------------------------
def init_params(key, lstm_hidden_units, lstm_layers_num,
                dense_piano_units=100, dense_notes_units=10, input_size=88):
    H = lstm_hidden_units

    def uniform(k, shape, bound):
        return jax.random.uniform(k, shape, jnp.float32, -bound, bound)

    params = {"lstm_w_ih": [], "lstm_w_hh": [], "lstm_b": []}
    k_lstm = 1.0 / math.sqrt(H)
    for layer in range(lstm_layers_num):
        d_in = input_size if layer == 0 else H
        key, k1, k2, k3, k4 = jax.random.split(key, 5)
        w_ih = uniform(k1, (4 * H, d_in), k_lstm)      # PyTorch weight_ih_l{k}
        w_hh = uniform(k2, (4 * H, H), k_lstm)         # PyTorch weight_hh_l{k}
        b_ih = uniform(k3, (4 * H,), k_lstm)
        b_hh = uniform(k4, (4 * H,), k_lstm)
        params["lstm_w_ih"].append(w_ih.T)                     # [D_l, 4H]
        params["lstm_w_hh"].append(w_hh.T)                     # [H, 4H]
        params["lstm_b"].append((b_ih + b_hh).reshape(1, 4 * H))

    def linear(key, d_in, d_out):
        key, k1, k2 = jax.random.split(key, 3)
        bound = 1.0 / math.sqrt(d_in)
        return key, uniform(k1, (d_out, d_in), bound), uniform(k2, (d_out,), bound)

    key, wp, bp = linear(key, H, dense_piano_units)            # dense_piano
    key, wn, bn = linear(key, H, dense_notes_units)            # dense_notes
    key, wop, bop = linear(key, dense_piano_units, PIANO_KEYS) # out_piano
    key, won, bon = linear(key, dense_notes_units, 1)          # out_num_notes

    P1, P2 = dense_piano_units, dense_notes_units
    hid_pad = _round_up(P1 + P2, 128)
    out_pad = _round_up(PIANO_KEYS + 1, 128)

    w1 = jnp.zeros((H, hid_pad), jnp.float32)
    w1 = w1.at[:, :P1].set(wp.T).at[:, P1:P1 + P2].set(wn.T)
    b1 = jnp.zeros((1, hid_pad), jnp.float32)
    b1 = b1.at[0, :P1].set(bp).at[0, P1:P1 + P2].set(bn)

    w2 = jnp.zeros((hid_pad, out_pad), jnp.float32)
    w2 = (w2.at[:P1, :PIANO_KEYS].set(wop.T)
             .at[P1:P1 + P2, PIANO_KEYS:PIANO_KEYS + 1].set(won.T))
    b2 = jnp.zeros((1, out_pad), jnp.float32)
    b2 = (b2.at[0, :PIANO_KEYS].set(bop)
             .at[0, PIANO_KEYS:PIANO_KEYS + 1].set(bon))       # fixed scatter

    params.update(w1=w1, b1=b1, w2=w2, b2=b2)
    # Raw head weights kept only for the pure-JAX reference check.
    params["raw_heads"] = dict(wp=wp, bp=bp, wn=wn, bn=bn,
                               wop=wop, bop=bop, won=won, bon=bon)
    return params


# ----------------------------------------------------------------------------
# Full forward (matches RNN_net.forward with dropout_prob=0, state=None).
# ----------------------------------------------------------------------------
@jax.jit
def rnn_net_forward(params, x):
    # x: [B, T, 88], batch_first like the PyTorch module.
    B, T, D = x.shape
    x_tm = jnp.transpose(x, (1, 0, 2)).astype(jnp.float32)     # [T, B, 88]
    x2d = x_tm.reshape(T * B, D)

    out_tm, h_n, c_n = fused_forward(
        x2d, params["lstm_w_ih"], params["lstm_w_hh"], params["lstm_b"],
        params["w1"], params["b1"], params["w2"], params["b2"],
        batch=B, seq_len=T)

    # Slice the narrow heads first, then transpose to batch-first.
    x_piano = jnp.transpose(out_tm[..., :PIANO_KEYS], (1, 0, 2))            # [B,T,88]
    x_num_notes = jnp.transpose(out_tm[..., PIANO_KEYS:PIANO_KEYS + 1],
                                (1, 0, 2))                                  # [B,T,1]
    return x_piano, x_num_notes, (h_n, c_n)


# ----------------------------------------------------------------------------
# Pure-JAX reference (mirrors the PyTorch module) for correctness checking.
# ----------------------------------------------------------------------------
def reference_forward(params, x):
    B, T, _ = x.shape
    L = len(params["lstm_w_ih"])
    H = params["lstm_w_hh"][0].shape[0]
    y = x.astype(jnp.float32)
    hs, cs = [], []
    for l in range(L):
        w_ih, w_hh, b = (params["lstm_w_ih"][l], params["lstm_w_hh"][l],
                         params["lstm_b"][l])

        def step(carry, x_t):
            h, c = carry
            gates = x_t @ w_ih + h @ w_hh + b
            i, f, g, o = jnp.split(gates, 4, axis=-1)
            c = jax.nn.sigmoid(f) * c + jax.nn.sigmoid(i) * jnp.tanh(g)
            h = jax.nn.sigmoid(o) * jnp.tanh(c)
            return (h, c), h

        init = (jnp.zeros((B, H), jnp.float32), jnp.zeros((B, H), jnp.float32))
        (h_f, c_f), ys = lax.scan(step, init, jnp.transpose(y, (1, 0, 2)))
        y = jnp.transpose(ys, (1, 0, 2))
        hs.append(h_f)
        cs.append(c_f)

    r = params["raw_heads"]
    leaky = lambda v: jnp.where(v > 0, v, 0.01 * v)
    x_piano = leaky(y @ r["wp"].T + r["bp"]) @ r["wop"].T + r["bop"]
    x_num = leaky(y @ r["wn"].T + r["bn"]) @ r["won"].T + r["bon"]
    return x_piano, x_num, (jnp.stack(hs), jnp.stack(cs))


if __name__ == "__main__":
    B, T, D_IN = 8, 8, 88
    LSTM_HIDDEN = 32
    LSTM_LAYERS = 2

    key = jax.random.PRNGKey(0)
    key, k_x, k_p = jax.random.split(key, 3)
    x = jax.random.normal(k_x, (B, T, D_IN), jnp.float32)
    params = init_params(k_p, LSTM_HIDDEN, LSTM_LAYERS)

    x_piano, x_num_notes, (h_n, c_n) = rnn_net_forward(params, x)
    jax.block_until_ready((x_piano, x_num_notes, h_n, c_n))

    assert x_piano.shape == (B, T, PIANO_KEYS)
    assert x_num_notes.shape == (B, T, 1)
    assert h_n.shape == (LSTM_LAYERS, B, LSTM_HIDDEN)
    assert c_n.shape == (LSTM_LAYERS, B, LSTM_HIDDEN)
    assert bool(jnp.all(jnp.isfinite(x_piano)))
    assert bool(jnp.all(jnp.isfinite(x_num_notes)))

    rp, rn, (rh, rc) = reference_forward(params, x)
    assert bool(jnp.allclose(x_piano, rp, rtol=2e-3, atol=2e-3))
    assert bool(jnp.allclose(x_num_notes, rn, rtol=2e-3, atol=2e-3))
    assert bool(jnp.allclose(h_n, rh, rtol=2e-3, atol=2e-3))
    assert bool(jnp.allclose(c_n, rc, rtol=2e-3, atol=2e-3))

    print("KERNEL_OK")
</pallas_src>

<mosaic_0001>
module attributes {stable_mosaic.version = 11 : i64} {
  func.func @kernel(%arg0: memref<64x88xf32, #tpu.memory_space<vmem>>, %arg1: memref<88x128xf32, #tpu.memory_space<vmem>>, %arg2: memref<32x128xf32, #tpu.memory_space<vmem>>, %arg3: memref<32x128xf32, #tpu.memory_space<vmem>>, %arg4: memref<32x128xf32, #tpu.memory_space<vmem>>, %arg5: memref<1x128xf32, #tpu.memory_space<vmem>>, %arg6: memref<1x128xf32, #tpu.memory_space<vmem>>, %arg7: memref<32x128xf32, #tpu.memory_space<vmem>>, %arg8: memref<1x128xf32, #tpu.memory_space<vmem>>, %arg9: memref<128x128xf32, #tpu.memory_space<vmem>>, %arg10: memref<1x128xf32, #tpu.memory_space<vmem>>, %arg11: memref<8x8x128xf32, #tpu.memory_space<vmem>>, %arg12: memref<2x8x32xf32, #tpu.memory_space<vmem>>, %arg13: memref<2x8x32xf32, #tpu.memory_space<vmem>>, %arg14: memref<8x8x128xf32, #tpu.memory_space<vmem>>, %arg15: memref<8x8x32xf32, #tpu.memory_space<vmem>>) attributes {dimension_semantics = [], scalar_prefetch = 0 : i64, scratch_operands = 2 : i64, tpu.core_type = #tpu.core_type<tc>} {
    %0 = tpu.iota {dimensions = array<i32: 1>} : vector<8x128xi32>
    %c64_i32 = arith.constant 64 : i32
    %1 = vector.broadcast %c64_i32 : i32 to vector<8x128xi32>
    %2 = arith.cmpi sge, %0, %1 : vector<8x128xi32>
    %c96_i32 = arith.constant 96 : i32
    %3 = vector.broadcast %c96_i32 : i32 to vector<8x128xi32>
    %4 = arith.cmpi slt, %0, %3 : vector<8x128xi32>
    %5 = arith.andi %2, %4 : vector<8x128xi1>
    %c0 = arith.constant 0 : index
    %c0_0 = arith.constant 0 : index
    %6 = vector.load %arg3[%c0, %c0_0] : memref<32x128xf32, #tpu.memory_space<vmem>>, vector<32x128xf32>
    %c0_1 = arith.constant 0 : index
    %c0_2 = arith.constant 0 : index
    %7 = vector.load %arg0[%c0_1, %c0_2] : memref<64x88xf32, #tpu.memory_space<vmem>>, vector<64x88xf32>
    %c0_3 = arith.constant 0 : index
    %c0_4 = arith.constant 0 : index
    %8 = vector.load %arg1[%c0_3, %c0_4] : memref<88x128xf32, #tpu.memory_space<vmem>>, vector<88x128xf32>
    %cst = arith.constant dense<0.000000e+00> : vector<64x128xf32>
    %9 = tpu.matmul %7, %8, %cst {dimension_numbers = #tpu.dot_dimension_numbers<[1], [0], [0], [1], [0, 0, 1, 1], [], []>} : vector<64x88xf32>, vector<88x128xf32>, vector<64x128xf32> -> vector<64x128xf32>
    %c0_5 = arith.constant 0 : index
    %c0_6 = arith.constant 0 : index
    %10 = vector.load %arg5[%c0_5, %c0_6] : memref<1x128xf32, #tpu.memory_space<vmem>>, vector<1x128xf32>
    %11 = vector.broadcast %10 : vector<1x128xf32> to vector<64x128xf32>
    %12 = arith.addf %9, %11 : vector<64x128xf32>
    %13 = vector.shape_cast %12 : vector<64x128xf32> to vector<8x8x128xf32>
    %c0_7 = arith.constant 0 : index
    %c0_8 = arith.constant 0 : index
    %c0_9 = arith.constant 0 : index
    %14 = vector.load %arg14[%c0_7, %c0_8, %c0_9] : memref<8x8x128xf32, #tpu.memory_space<vmem>>, vector<8x8x128xf32>
    tpu.vector_store %arg14[%c0_7, %c0_8, %c0_9], %13 {strides = array<i32>} : memref<8x8x128xf32, #tpu.memory_space<vmem>>, vector<8x8x128xf32>,
    %cst_10 = arith.constant 0.000000e+00 : f32
    %15 = vector.broadcast %cst_10 : f32 to vector<8x32xf32>
    %c0_i32 = arith.constant 0 : i32
    %16 = arith.index_cast %c0_i32 : i32 to index
    %c0_11 = arith.constant 0 : index
    %c0_12 = arith.constant 0 : index
    %17 = vector.load %arg14[%16, %c0_11, %c0_12] : memref<8x8x128xf32, #tpu.memory_space<vmem>>, vector<1x8x128xf32>
    %18 = vector.shape_cast %17 : vector<1x8x128xf32> to vector<8x128xf32>
    %cst_13 = arith.constant dense<0.000000e+00> : vector<8x128xf32>
    %19 = tpu.matmul %15, %6, %cst_13 {dimension_numbers = #tpu.dot_dimension_numbers<[1], [0], [0], [1], [0, 0, 1, 1], [], []>} : vector<8x32xf32>, vector<32x128xf32>, vector<8x128xf32> -> vector<8x128xf32>
    %20 = arith.addf %18, %19 : vector<8x128xf32>
    %21 = math.tanh %20 : vector<8x128xf32>
    %22 = arith.negf %20 : vector<8x128xf32>
    %23 = math.exp %22 : vector<8x128xf32>
    %cst_14 = arith.constant 1.000000e+00 : f32
    %24 = vector.broadcast %cst_14 : f32 to vector<8x128xf32>
    %25 = arith.addf %24, %23 : vector<8x128xf32>
    %26 = arith.divf %24, %25 : vector<8x128xf32>
    %27 = arith.select %5, %21, %26 : vector<8x128xi1>, vector<8x128xf32>
    %28 = vector.extract_strided_slice %27 {offsets = [0, 0], sizes = [8, 32], strides = [1, 1]} : vector<8x128xf32> to vector<8x32xf32>
    %29 = vector.extract_strided_slice %27 {offsets = [0, 32], sizes = [8, 32], strides = [1, 1]} : vector<8x128xf32> to vector<8x32xf32>
    %30 = vector.extract_strided_slice %27 {offsets = [0, 64], sizes = [8, 32], strides = [1, 1]} : vector<8x128xf32> to vector<8x32xf32>
    %31 = vector.extract_strided_slice %27 {offsets = [0, 96], sizes = [8, 32], strides = [1, 1]} : vector<8x128xf32> to vector<8x32xf32>
    %32 = arith.mulf %29, %15 : vector<8x32xf32>
    %33 = arith.mulf %28, %30 : vector<8x32xf32>
    %34 = arith.addf %32, %33 : vector<8x32xf32>
    %35 = math.tanh %34 : vector<8x32xf32>
    %36 = arith.mulf %31, %35 : vector<8x32xf32>
    %37 = arith.index_cast %c0_i32 : i32 to index
    %c0_15 = arith.constant 0 : index
    %c0_16 = arith.constant 0 : index
    %38 = vector.load %arg15[%37, %c0_15, %c0_16] : memref<8x8x32xf32, #tpu.memory_space<vmem>>, vector<1x8x32xf32>
    %39 = vector.shape_cast %38 : vector<1x8x32xf32> to vector<8x32xf32>
    %40 = vector.shape_cast %36 : vector<8x32xf32> to vector<1x8x32xf32>
    tpu.vector_store %arg15[%37, %c0_15, %c0_16], %40 {strides = array<i32>} : memref<8x8x32xf32, #tpu.memory_space<vmem>>, vector<1x8x32xf32>,
    %c1_i32 = arith.constant 1 : i32
    %41 = arith.index_cast %c1_i32 : i32 to index
    %c0_17 = arith.constant 0 : index
    %c0_18 = arith.constant 0 : index
    %42 = vector.load %arg14[%41, %c0_17, %c0_18] : memref<8x8x128xf32, #tpu.memory_space<vmem>>, vector<1x8x128xf32>
    %43 = vector.shape_cast %42 : vector<1x8x128xf32> to vector<8x128xf32>
    %cst_19 = arith.constant dense<0.000000e+00> : vector<8x128xf32>
    %44 = tpu.matmul %36, %6, %cst_19 {dimension_numbers = #tpu.dot_dimension_numbers<[1], [0], [0], [1], [0, 0, 1, 1], [], []>} : vector<8x32xf32>, vector<32x128xf32>, vector<8x128xf32> -> vector<8x128xf32>
    %45 = arith.addf %43, %44 : vector<8x128xf32>
    %46 = math.tanh %45 : vector<8x128xf32>
    %47 = arith.negf %45 : vector<8x128xf32>
    %48 = math.exp %47 : vector<8x128xf32>
    %cst_20 = arith.constant 1.000000e+00 : f32
    %49 = vector.broadcast %cst_20 : f32 to vector<8x128xf32>
    %50 = arith.addf %49, %48 : vector<8x128xf32>
    %51 = arith.divf %49, %50 : vector<8x128xf32>
    %52 = arith.select %5, %46, %51 : vector<8x128xi1>, vector<8x128xf32>
    %53 = vector.extract_strided_slice %52 {offsets = [0, 0], sizes = [8, 32], strides = [1, 1]} : vector<8x128xf32> to vector<8x32xf32>
    %54 = vector.extract_strided_slice %52 {offsets = [0, 32], sizes = [8, 32], strides = [1, 1]} : vector<8x128xf32> to vector<8x32xf32>
    %55 = vector.extract_strided_slice %52 {offsets = [0, 64], sizes = [8, 32], strides = [1, 1]} : vector<8x128xf32> to vector<8x32xf32>
    %56 = vector.extract_strided_slice %52 {offsets = [0, 96], sizes = [8, 32], strides = [1, 1]} : vector<8x128xf32> to vector<8x32xf32>
    %57 = arith.mulf %54, %34 : vector<8x32xf32>
    %58 = arith.mulf %53, %55 : vector<8x32xf32>
    %59 = arith.addf %57, %58 : vector<8x32xf32>
    %60 = math.tanh %59 : vector<8x32xf32>
    %61 = arith.mulf %56, %60 : vector<8x32xf32>
    %62 = arith.index_cast %c1_i32 : i32 to index
    %c0_21 = arith.constant 0 : index
    %c0_22 = arith.constant 0 : index
    %63 = vector.load %arg15[%62, %c0_21, %c0_22] : memref<8x8x32xf32, #tpu.memory_space<vmem>>, vector<1x8x32xf32>
    %64 = vector.shape_cast %63 : vector<1x8x32xf32> to vector<8x32xf32>
    %65 = vector.shape_cast %61 : vector<8x32xf32> to vector<1x8x32xf32>
    tpu.vector_store %arg15[%62, %c0_21, %c0_22], %65 {strides = array<i32>} : memref<8x8x32xf32, #tpu.memory_space<vmem>>, vector<1x8x32xf32>,
    %c2_i32 = arith.constant 2 : i32
    %66 = arith.index_cast %c2_i32 : i32 to index
    %c0_23 = arith.constant 0 : index
    %c0_24 = arith.constant 0 : index
    %67 = vector.load %arg14[%66, %c0_23, %c0_24] : memref<8x8x128xf32, #tpu.memory_space<vmem>>, vector<1x8x128xf32>
    %68 = vector.shape_cast %67 : vector<1x8x128xf32> to vector<8x128xf32>
    %cst_25 = arith.constant dense<0.000000e+00> : vector<8x128xf32>
    %69 = tpu.matmul %61, %6, %cst_25 {dimension_numbers = #tpu.dot_dimension_numbers<[1], [0], [0], [1], [0, 0, 1, 1], [], []>} : vector<8x32xf32>, vector<32x128xf32>, vector<8x128xf32> -> vector<8x128xf32>
    %70 = arith.addf %68, %69 : vector<8x128xf32>
    %71 = math.tanh %70 : vector<8x128xf32>
    %72 = arith.negf %70 : vector<8x128xf32>
    %73 = math.exp %72 : vector<8x128xf32>
    %cst_26 = arith.constant 1.000000e+00 : f32
    %74 = vector.broadcast %cst_26 : f32 to vector<8x128xf32>
    %75 = arith.addf %74, %73 : vector<8x128xf32>
    %76 = arith.divf %74, %75 : vector<8x128xf32>
    %77 = arith.select %5, %71, %76 : vector<8x128xi1>, vector<8x128xf32>
    %78 = vector.extract_strided_slice %77 {offsets = [0, 0], sizes = [8, 32], strides = [1, 1]} : vector<8x128xf32> to vector<8x32xf32>
    %79 = vector.extract_strided_slice %77 {offsets = [0, 32], sizes = [8, 32], strides = [1, 1]} : vector<8x128xf32> to vector<8x32xf32>
    %80 = vector.extract_strided_slice %77 {offsets = [0, 64], sizes = [8, 32], strides = [1, 1]} : vector<8x128xf32> to vector<8x32xf32>
    %81 = vector.extract_strided_slice %77 {offsets = [0, 96], sizes = [8, 32], strides = [1, 1]} : vector<8x128xf32> to vector<8x32xf32>
    %82 = arith.mulf %79, %59 : vector<8x32xf32>
    %83 = arith.mulf %78, %80 : vector<8x32xf32>
    %84 = arith.addf %82, %83 : vector<8x32xf32>
    %85 = math.tanh %84 : vector<8x32xf32>
    %86 = arith.mulf %81, %85 : vector<8x32xf32>
    %87 = arith.index_cast %c2_i32 : i32 to index
    %c0_27 = arith.constant 0 : index
    %c0_28 = arith.constant 0 : index
    %88 = vector.load %arg15[%87, %c0_27, %c0_28] : memref<8x8x32xf32, #tpu.memory_space<vmem>>, vector<1x8x32xf32>
    %89 = vector.shape_cast %88 : vector<1x8x32xf32> to vector<8x32xf32>
    %90 = vector.shape_cast %86 : vector<8x32xf32> to vector<1x8x32xf32>
    tpu.vector_store %arg15[%87, %c0_27, %c0_28], %90 {strides = array<i32>} : memref<8x8x32xf32, #tpu.memory_space<vmem>>, vector<1x8x32xf32>,
    %c3_i32 = arith.constant 3 : i32
    %91 = arith.index_cast %c3_i32 : i32 to index
    %c0_29 = arith.constant 0 : index
    %c0_30 = arith.constant 0 : index
    %92 = vector.load %arg14[%91, %c0_29, %c0_30] : memref<8x8x128xf32, #tpu.memory_space<vmem>>, vector<1x8x128xf32>
    %93 = vector.shape_cast %92 : vector<1x8x128xf32> to vector<8x128xf32>
    %cst_31 = arith.constant dense<0.000000e+00> : vector<8x128xf32>
    %94 = tpu.matmul %86, %6, %cst_31 {dimension_numbers = #tpu.dot_dimension_numbers<[1], [0], [0], [1], [0, 0, 1, 1], [], []>} : vector<8x32xf32>, vector<32x128xf32>, vector<8x128xf32> -> vector<8x128xf32>
    %95 = arith.addf %93, %94 : vector<8x128xf32>
    %96 = math.tanh %95 : vector<8x128xf32>
    %97 = arith.negf %95 : vector<8x128xf32>
    %98 = math.exp %97 : vector<8x128xf32>
    %cst_32 = arith.constant 1.000000e+00 : f32
    %99 = vector.broadcast %cst_32 : f32 to vector<8x128xf32>
    %100 = arith.addf %99, %98 : vector<8x128xf32>
    %101 = arith.divf %99, %100 : vector<8x128xf32>
    %102 = arith.select %5, %96, %101 : vector<8x128xi1>, vector<8x128xf32>
    %103 = vector.extract_strided_slice %102 {offsets = [0, 0], sizes = [8, 32], strides = [1, 1]} : vector<8x128xf32> to vector<8x32xf32>
    %104 = vector.extract_strided_slice %102 {offsets = [0, 32], sizes = [8, 32], strides = [1, 1]} : vector<8x128xf32> to vector<8x32xf32>
    %105 = vector.extract_strided_slice %102 {offsets = [0, 64], sizes = [8, 32], strides = [1, 1]} : vector<8x128xf32> to vector<8x32xf32>
    %106 = vector.extract_strided_slice %102 {offsets = [0, 96], sizes = [8, 32], strides = [1, 1]} : vector<8x128xf32> to vector<8x32xf32>
    %107 = arith.mulf %104, %84 : vector<8x32xf32>
    %108 = arith.mulf %103, %105 : vector<8x32xf32>
    %109 = arith.addf %107, %108 : vector<8x32xf32>
    %110 = math.tanh %109 : vector<8x32xf32>
    %111 = arith.mulf %106, %110 : vector<8x32xf32>
    %112 = arith.index_cast %c3_i32 : i32 to index
    %c0_33 = arith.constant 0 : index
    %c0_34 = arith.constant 0 : index
    %113 = vector.load %arg15[%112, %c0_33, %c0_34] : memref<8x8x32xf32, #tpu.memory_space<vmem>>, vector<1x8x32xf32>
    %114 = vector.shape_cast %113 : vector<1x8x32xf32> to vector<8x32xf32>
    %115 = vector.shape_cast %111 : vector<8x32xf32> to vector<1x8x32xf32>
    tpu.vector_store %arg15[%112, %c0_33, %c0_34], %115 {strides = array<i32>} : memref<8x8x32xf32, #tpu.memory_space<vmem>>, vector<1x8x32xf32>,
    %c4_i32 = arith.constant 4 : i32
    %116 = arith.index_cast %c4_i32 : i32 to index
    %c0_35 = arith.constant 0 : index
    %c0_36 = arith.constant 0 : index
    %117 = vector.load %arg14[%116, %c0_35, %c0_36] : memref<8x8x128xf32, #tpu.memory_space<vmem>>, vector<1x8x128xf32>
    %118 = vector.shape_cast %117 : vector<1x8x128xf32> to vector<8x128xf32>
    %cst_37 = arith.constant dense<0.000000e+00> : vector<8x128xf32>
    %119 = tpu.matmul %111, %6, %cst_37 {dimension_numbers = #tpu.dot_dimension_numbers<[1], [0], [0], [1], [0, 0, 1, 1], [], []>} : vector<8x32xf32>, vector<32x128xf32>, vector<8x128xf32> -> vector<8x128xf32>
    %120 = arith.addf %118, %119 : vector<8x128xf32>
    %121 = math.tanh %120 : vector<8x128xf32>
    %122 = arith.negf %120 : vector<8x128xf32>
    %123 = math.exp %122 : vector<8x128xf32>
    %cst_38 = arith.constant 1.000000e+00 : f32
    %124 = vector.broadcast %cst_38 : f32 to vector<8x128xf32>
    %125 = arith.addf %124, %123 : vector<8x128xf32>
    %126 = arith.divf %124, %125 : vector<8x128xf32>
    %127 = arith.select %5, %121, %126 : vector<8x128xi1>, vector<8x128xf32>
    %128 = vector.extract_strided_slice %127 {offsets = [0, 0], sizes = [8, 32], strides = [1, 1]} : vector<8x128xf32> to vector<8x32xf32>
    %129 = vector.extract_strided_slice %127 {offsets = [0, 32], sizes = [8, 32], strides = [1, 1]} : vector<8x128xf32> to vector<8x32xf32>
    %130 = vector.extract_strided_slice %127 {offsets = [0, 64], sizes = [8, 32], strides = [1, 1]} : vector<8x128xf32> to vector<8x32xf32>
    %131 = vector.extract_strided_slice %127 {offsets = [0, 96], sizes = [8, 32], strides = [1, 1]} : vector<8x128xf32> to vector<8x32xf32>
    %132 = arith.mulf %129, %109 : vector<8x32xf32>
    %133 = arith.mulf %128, %130 : vector<8x32xf32>
    %134 = arith.addf %132, %133 : vector<8x32xf32>
    %135 = math.tanh %134 : vector<8x32xf32>
    %136 = arith.mulf %131, %135 : vector<8x32xf32>
    %137 = arith.index_cast %c4_i32 : i32 to index
    %c0_39 = arith.constant 0 : index
    %c0_40 = arith.constant 0 : index
    %138 = vector.load %arg15[%137, %c0_39, %c0_40] : memref<8x8x32xf32, #tpu.memory_space<vmem>>, vector<1x8x32xf32>
    %139 = vector.shape_cast %138 : vector<1x8x32xf32> to vector<8x32xf32>
    %140 = vector.shape_cast %136 : vector<8x32xf32> to vector<1x8x32xf32>
    tpu.vector_store %arg15[%137, %c0_39, %c0_40], %140 {strides = array<i32>} : memref<8x8x32xf32, #tpu.memory_space<vmem>>, vector<1x8x32xf32>,
    %c5_i32 = arith.constant 5 : i32
    %141 = arith.index_cast %c5_i32 : i32 to index
    %c0_41 = arith.constant 0 : index
    %c0_42 = arith.constant 0 : index
    %142 = vector.load %arg14[%141, %c0_41, %c0_42] : memref<8x8x128xf32, #tpu.memory_space<vmem>>, vector<1x8x128xf32>
    %143 = vector.shape_cast %142 : vector<1x8x128xf32> to vector<8x128xf32>
    %cst_43 = arith.constant dense<0.000000e+00> : vector<8x128xf32>
    %144 = tpu.matmul %136, %6, %cst_43 {dimension_numbers = #tpu.dot_dimension_numbers<[1], [0], [0], [1], [0, 0, 1, 1], [], []>} : vector<8x32xf32>, vector<32x128xf32>, vector<8x128xf32> -> vector<8x128xf32>
    %145 = arith.addf %143, %144 : vector<8x128xf32>
    %146 = math.tanh %145 : vector<8x128xf32>
    %147 = arith.negf %145 : vector<8x128xf32>
    %148 = math.exp %147 : vector<8x128xf32>
    %cst_44 = arith.constant 1.000000e+00 : f32
    %149 = vector.broadcast %cst_44 : f32 to vector<8x128xf32>
    %150 = arith.addf %149, %148 : vector<8x128xf32>
    %151 = arith.divf %149, %150 : vector<8x128xf32>
    %152 = arith.select %5, %146, %151 : vector<8x128xi1>, vector<8x128xf32>
    %153 = vector.extract_strided_slice %152 {offsets = [0, 0], sizes = [8, 32], strides = [1, 1]} : vector<8x128xf32> to vector<8x32xf32>
    %154 = vector.extract_strided_slice %152 {offsets = [0, 32], sizes = [8, 32], strides = [1, 1]} : vector<8x128xf32> to vector<8x32xf32>
    %155 = vector.extract_strided_slice %152 {offsets = [0, 64], sizes = [8, 32], strides = [1, 1]} : vector<8x128xf32> to vector<8x32xf32>
    %156 = vector.extract_strided_slice %152 {offsets = [0, 96], sizes = [8, 32], strides = [1, 1]} : vector<8x128xf32> to vector<8x32xf32>
    %157 = arith.mulf %154, %134 : vector<8x32xf32>
    %158 = arith.mulf %153, %155 : vector<8x32xf32>
    %159 = arith.addf %157, %158 : vector<8x32xf32>
    %160 = math.tanh %159 : vector<8x32xf32>
    %161 = arith.mulf %156, %160 : vector<8x32xf32>
    %162 = arith.index_cast %c5_i32 : i32 to index
    %c0_45 = arith.constant 0 : index
    %c0_46 = arith.constant 0 : index
    %163 = vector.load %arg15[%162, %c0_45, %c0_46] : memref<8x8x32xf32, #tpu.memory_space<vmem>>, vector<1x8x32xf32>
    %164 = vector.shape_cast %163 : vector<1x8x32xf32> to vector<8x32xf32>
    %165 = vector.shape_cast %161 : vector<8x32xf32> to vector<1x8x32xf32>
    tpu.vector_store %arg15[%162, %c0_45, %c0_46], %165 {strides = array<i32>} : memref<8x8x32xf32, #tpu.memory_space<vmem>>, vector<1x8x32xf32>,
    %c6_i32 = arith.constant 6 : i32
    %166 = arith.index_cast %c6_i32 : i32 to index
    %c0_47 = arith.constant 0 : index
    %c0_48 = arith.constant 0 : index
    %167 = vector.load %arg14[%166, %c0_47, %c0_48] : memref<8x8x128xf32, #tpu.memory_space<vmem>>, vector<1x8x128xf32>
    %168 = vector.shape_cast %167 : vector<1x8x128xf32> to vector<8x128xf32>
    %cst_49 = arith.constant dense<0.000000e+00> : vector<8x128xf32>
    %169 = tpu.matmul %161, %6, %cst_49 {dimension_numbers = #tpu.dot_dimension_numbers<[1], [0], [0], [1], [0, 0, 1, 1], [], []>} : vector<8x32xf32>, vector<32x128xf32>, vector<8x128xf32> -> vector<8x128xf32>
    %170 = arith.addf %168, %169 : vector<8x128xf32>
    %171 = math.tanh %170 : vector<8x128xf32>
    %172 = arith.negf %170 : vector<8x128xf32>
    %173 = math.exp %172 : vector<8x128xf32>
    %cst_50 = arith.constant 1.000000e+00 : f32
    %174 = vector.broadcast %cst_50 : f32 to vector<8x128xf32>
    %175 = arith.addf %174, %173 : vector<8x128xf32>
    %176 = arith.divf %174, %175 : vector<8x128xf32>
    %177 = arith.select %5, %171, %176 : vector<8x128xi1>, vector<8x128xf32>
    %178 = vector.extract_strided_slice %177 {offsets = [0, 0], sizes = [8, 32], strides = [1, 1]} : vector<8x128xf32> to vector<8x32xf32>
    %179 = vector.extract_strided_slice %177 {offsets = [0, 32], sizes = [8, 32], strides = [1, 1]} : vector<8x128xf32> to vector<8x32xf32>
    %180 = vector.extract_strided_slice %177 {offsets = [0, 64], sizes = [8, 32], strides = [1, 1]} : vector<8x128xf32> to vector<8x32xf32>
    %181 = vector.extract_strided_slice %177 {offsets = [0, 96], sizes = [8, 32], strides = [1, 1]} : vector<8x128xf32> to vector<8x32xf32>
    %182 = arith.mulf %179, %159 : vector<8x32xf32>
    %183 = arith.mulf %178, %180 : vector<8x32xf32>
    %184 = arith.addf %182, %183 : vector<8x32xf32>
    %185 = math.tanh %184 : vector<8x32xf32>
    %186 = arith.mulf %181, %185 : vector<8x32xf32>
    %187 = arith.index_cast %c6_i32 : i32 to index
    %c0_51 = arith.constant 0 : index
    %c0_52 = arith.constant 0 : index
    %188 = vector.load %arg15[%187, %c0_51, %c0_52] : memref<8x8x32xf32, #tpu.memory_space<vmem>>, vector<1x8x32xf32>
    %189 = vector.shape_cast %188 : vector<1x8x32xf32> to vector<8x32xf32>
    %190 = vector.shape_cast %186 : vector<8x32xf32> to vector<1x8x32xf32>
    tpu.vector_store %arg15[%187, %c0_51, %c0_52], %190 {strides = array<i32>} : memref<8x8x32xf32, #tpu.memory_space<vmem>>, vector<1x8x32xf32>,
    %c7_i32 = arith.constant 7 : i32
    %191 = arith.index_cast %c7_i32 : i32 to index
    %c0_53 = arith.constant 0 : index
    %c0_54 = arith.constant 0 : index
    %192 = vector.load %arg14[%191, %c0_53, %c0_54] : memref<8x8x128xf32, #tpu.memory_space<vmem>>, vector<1x8x128xf32>
    %193 = vector.shape_cast %192 : vector<1x8x128xf32> to vector<8x128xf32>
    %cst_55 = arith.constant dense<0.000000e+00> : vector<8x128xf32>
    %194 = tpu.matmul %186, %6, %cst_55 {dimension_numbers = #tpu.dot_dimension_numbers<[1], [0], [0], [1], [0, 0, 1, 1], [], []>} : vector<8x32xf32>, vector<32x128xf32>, vector<8x128xf32> -> vector<8x128xf32>
    %195 = arith.addf %193, %194 : vector<8x128xf32>
    %196 = math.tanh %195 : vector<8x128xf32>
    %197 = arith.negf %195 : vector<8x128xf32>
    %198 = math.exp %197 : vector<8x128xf32>
    %cst_56 = arith.constant 1.000000e+00 : f32
    %199 = vector.broadcast %cst_56 : f32 to vector<8x128xf32>
    %200 = arith.addf %199, %198 : vector<8x128xf32>
    %201 = arith.divf %199, %200 : vector<8x128xf32>
    %202 = arith.select %5, %196, %201 : vector<8x128xi1>, vector<8x128xf32>
    %203 = vector.extract_strided_slice %202 {offsets = [0, 0], sizes = [8, 32], strides = [1, 1]} : vector<8x128xf32> to vector<8x32xf32>
    %204 = vector.extract_strided_slice %202 {offsets = [0, 32], sizes = [8, 32], strides = [1, 1]} : vector<8x128xf32> to vector<8x32xf32>
    %205 = vector.extract_strided_slice %202 {offsets = [0, 64], sizes = [8, 32], strides = [1, 1]} : vector<8x128xf32> to vector<8x32xf32>
    %206 = vector.extract_strided_slice %202 {offsets = [0, 96], sizes = [8, 32], strides = [1, 1]} : vector<8x128xf32> to vector<8x32xf32>
    %207 = arith.mulf %204, %184 : vector<8x32xf32>
    %208 = arith.mulf %203, %205 : vector<8x32xf32>
    %209 = arith.addf %207, %208 : vector<8x32xf32>
    %210 = math.tanh %209 : vector<8x32xf32>
    %211 = arith.mulf %206, %210 : vector<8x32xf32>
    %212 = arith.index_cast %c7_i32 : i32 to index
    %c0_57 = arith.constant 0 : index
    %c0_58 = arith.constant 0 : index
    %213 = vector.load %arg15[%212, %c0_57, %c0_58] : memref<8x8x32xf32, #tpu.memory_space<vmem>>, vector<1x8x32xf32>
    %214 = vector.shape_cast %213 : vector<1x8x32xf32> to vector<8x32xf32>
    %215 = vector.shape_cast %211 : vector<8x32xf32> to vector<1x8x32xf32>
    tpu.vector_store %arg15[%212, %c0_57, %c0_58], %215 {strides = array<i32>} : memref<8x8x32xf32, #tpu.memory_space<vmem>>, vector<1x8x32xf32>,
    %c8_i32 = arith.constant 8 : i32
    %c0_59 = arith.constant 0 : index
    %c0_60 = arith.constant 0 : index
    %c0_61 = arith.constant 0 : index
    %216 = vector.load %arg12[%c0_59, %c0_60, %c0_61] : memref<2x8x32xf32, #tpu.memory_space<vmem>>, vector<1x8x32xf32>
    %217 = vector.shape_cast %216 : vector<1x8x32xf32> to vector<8x32xf32>
    %218 = vector.shape_cast %211 : vector<8x32xf32> to vector<1x8x32xf32>
    tpu.vector_store %arg12[%c0_59, %c0_60, %c0_61], %218 {strides = array<i32>} : memref<2x8x32xf32, #tpu.memory_space<vmem>>, vector<1x8x32xf32>,
    %c0_62 = arith.constant 0 : index
    %c0_63 = arith.constant 0 : index
    %c0_64 = arith.constant 0 : index
    %219 = vector.load %arg13[%c0_62, %c0_63, %c0_64] : memref<2x8x32xf32, #tpu.memory_space<vmem>>, vector<1x8x32xf32>
    %220 = vector.shape_cast %219 : vector<1x8x32xf32> to vector<8x32xf32>
    %221 = vector.shape_cast %209 : vector<8x32xf32> to vector<1x8x32xf32>
    tpu.vector_store %arg13[%c0_62, %c0_63, %c0_64], %221 {strides = array<i32>} : memref<2x8x32xf32, #tpu.memory_space<vmem>>, vector<1x8x32xf32>,
    %c0_65 = arith.constant 0 : index
    %c0_66 = arith.constant 0 : index
    %222 = vector.load %arg4[%c0_65, %c0_66] : memref<32x128xf32, #tpu.memory_space<vmem>>, vector<32x128xf32>
    %c0_67 = arith.constant 0 : index
    %c0_68 = arith.constant 0 : index
    %c0_69 = arith.constant 0 : index
    %223 = vector.load %arg15[%c0_67, %c0_68, %c0_69] : memref<8x8x32xf32, #tpu.memory_space<vmem>>, vector<8x8x32xf32>
    %224 = vector.shape_cast %223 : vector<8x8x32xf32> to vector<64x32xf32>
    %c0_70 = arith.constant 0 : index
    %c0_71 = arith.constant 0 : index
    %225 = vector.load %arg2[%c0_70, %c0_71] : memref<32x128xf32, #tpu.memory_space<vmem>>, vector<32x128xf32>
    %cst_72 = arith.constant dense<0.000000e+00> : vector<64x128xf32>
    %226 = tpu.matmul %224, %225, %cst_72 {dimension_numbers = #tpu.dot_dimension_numbers<[1], [0], [0], [1], [0, 0, 1, 1], [], []>} : vector<64x32xf32>, vector<32x128xf32>, vector<64x128xf32> -> vector<64x128xf32>
    %c0_73 = arith.constant 0 : index
    %c0_74 = arith.constant 0 : index
    %227 = vector.load %arg6[%c0_73, %c0_74] : memref<1x128xf32, #tpu.memory_space<vmem>>, vector<1x128xf32>
    %228 = vector.broadcast %227 : vector<1x128xf32> to vector<64x128xf32>
    %229 = arith.addf %226, %228 : vector<64x128xf32>
    %230 = vector.shape_cast %229 : vector<64x128xf32> to vector<8x8x128xf32>
    %c0_75 = arith.constant 0 : index
    %c0_76 = arith.constant 0 : index
    %c0_77 = arith.constant 0 : index
    %231 = vector.load %arg14[%c0_75, %c0_76, %c0_77] : memref<8x8x128xf32, #tpu.memory_space<vmem>>, vector<8x8x128xf32>
    tpu.vector_store %arg14[%c0_75, %c0_76, %c0_77], %230 {strides = array<i32>} : memref<8x8x128xf32, #tpu.memory_space<vmem>>, vector<8x8x128xf32>,
    %cst_78 = arith.constant 0.000000e+00 : f32
    %232 = vector.broadcast %cst_78 : f32 to vector<8x32xf32>
    %c0_i32_79 = arith.constant 0 : i32
    %233 = arith.index_cast %c0_i32_79 : i32 to index
    %c0_80 = arith.constant 0 : index
    %c0_81 = arith.constant 0 : index
    %234 = vector.load %arg14[%233, %c0_80, %c0_81] : memref<8x8x128xf32, #tpu.memory_space<vmem>>, vector<1x8x128xf32>
    %235 = vector.shape_cast %234 : vector<1x8x128xf32> to vector<8x128xf32>
    %cst_82 = arith.constant dense<0.000000e+00> : vector<8x128xf32>
    %236 = tpu.matmul %232, %222, %cst_82 {dimension_numbers = #tpu.dot_dimension_numbers<[1], [0], [0], [1], [0, 0, 1, 1], [], []>} : vector<8x32xf32>, vector<32x128xf32>, vector<8x128xf32> -> vector<8x128xf32>
    %237 = arith.addf %235, %236 : vector<8x128xf32>
    %238 = math.tanh %237 : vector<8x128xf32>
    %239 = arith.negf %237 : vector<8x128xf32>
    %240 = math.exp %239 : vector<8x128xf32>
    %cst_83 = arith.constant 1.000000e+00 : f32
    %241 = vector.broadcast %cst_83 : f32 to vector<8x128xf32>
    %242 = arith.addf %241, %240 : vector<8x128xf32>
    %243 = arith.divf %241, %242 : vector<8x128xf32>
    %244 = arith.select %5, %238, %243 : vector<8x128xi1>, vector<8x128xf32>
    %245 = vector.extract_strided_slice %244 {offsets = [0, 0], sizes = [8, 32], strides = [1, 1]} : vector<8x128xf32> to vector<8x32xf32>
    %246 = vector.extract_strided_slice %244 {offsets = [0, 32], sizes = [8, 32], strides = [1, 1]} : vector<8x128xf32> to vector<8x32xf32>
    %247 = vector.extract_strided_slice %244 {offsets = [0, 64], sizes = [8, 32], strides = [1, 1]} : vector<8x128xf32> to vector<8x32xf32>
    %248 = vector.extract_strided_slice %244 {offsets = [0, 96], sizes = [8, 32], strides = [1, 1]} : vector<8x128xf32> to vector<8x32xf32>
    %249 = arith.mulf %246, %232 : vector<8x32xf32>
    %250 = arith.mulf %245, %247 : vector<8x32xf32>
    %251 = arith.addf %249, %250 : vector<8x32xf32>
    %252 = math.tanh %251 : vector<8x32xf32>
    %253 = arith.mulf %248, %252 : vector<8x32xf32>
    %254 = arith.index_cast %c0_i32_79 : i32 to index
    %c0_84 = arith.constant 0 : index
    %c0_85 = arith.constant 0 : index
    %255 = vector.load %arg15[%254, %c0_84, %c0_85] : memref<8x8x32xf32, #tpu.memory_space<vmem>>, vector<1x8x32xf32>
    %256 = vector.shape_cast %255 : vector<1x8x32xf32> to vector<8x32xf32>
    %257 = vector.shape_cast %253 : vector<8x32xf32> to vector<1x8x32xf32>
    tpu.vector_store %arg15[%254, %c0_84, %c0_85], %257 {strides = array<i32>} : memref<8x8x32xf32, #tpu.memory_space<vmem>>, vector<1x8x32xf32>,
    %c1_i32_86 = arith.constant 1 : i32
    %258 = arith.index_cast %c1_i32_86 : i32 to index
    %c0_87 = arith.constant 0 : index
    %c0_88 = arith.constant 0 : index
    %259 = vector.load %arg14[%258, %c0_87, %c0_88] : memref<8x8x128xf32, #tpu.memory_space<vmem>>, vector<1x8x128xf32>
    %260 = vector.shape_cast %259 : vector<1x8x128xf32> to vector<8x128xf32>
    %cst_89 = arith.constant dense<0.000000e+00> : vector<8x128xf32>
    %261 = tpu.matmul %253, %222, %cst_89 {dimension_numbers = #tpu.dot_dimension_numbers<[1], [0], [0], [1], [0, 0, 1, 1], [], []>} : vector<8x32xf32>, vector<32x128xf32>, vector<8x128xf32> -> vector<8x128xf32>
    %262 = arith.addf %260, %261 : vector<8x128xf32>
    %263 = math.tanh %262 : vector<8x128xf32>
    %264 = arith.negf %262 : vector<8x128xf32>
    %265 = math.exp %264 : vector<8x128xf32>
    %cst_90 = arith.constant 1.000000e+00 : f32
    %266 = vector.broadcast %cst_90 : f32 to vector<8x128xf32>
    %267 = arith.addf %266, %265 : vector<8x128xf32>
    %268 = arith.divf %266, %267 : vector<8x128xf32>
    %269 = arith.select %5, %263, %268 : vector<8x128xi1>, vector<8x128xf32>
    %270 = vector.extract_strided_slice %269 {offsets = [0, 0], sizes = [8, 32], strides = [1, 1]} : vector<8x128xf32> to vector<8x32xf32>
    %271 = vector.extract_strided_slice %269 {offsets = [0, 32], sizes = [8, 32], strides = [1, 1]} : vector<8x128xf32> to vector<8x32xf32>
    %272 = vector.extract_strided_slice %269 {offsets = [0, 64], sizes = [8, 32], strides = [1, 1]} : vector<8x128xf32> to vector<8x32xf32>
    %273 = vector.extract_strided_slice %269 {offsets = [0, 96], sizes = [8, 32], strides = [1, 1]} : vector<8x128xf32> to vector<8x32xf32>
    %274 = arith.mulf %271, %251 : vector<8x32xf32>
    %275 = arith.mulf %270, %272 : vector<8x32xf32>
    %276 = arith.addf %274, %275 : vector<8x32xf32>
    %277 = math.tanh %276 : vector<8x32xf32>
    %278 = arith.mulf %273, %277 : vector<8x32xf32>
    %279 = arith.index_cast %c1_i32_86 : i32 to index
    %c0_91 = arith.constant 0 : index
    %c0_92 = arith.constant 0 : index
    %280 = vector.load %arg15[%279, %c0_91, %c0_92] : memref<8x8x32xf32, #tpu.memory_space<vmem>>, vector<1x8x32xf32>
    %281 = vector.shape_cast %280 : vector<1x8x32xf32> to vector<8x32xf32>
    %282 = vector.shape_cast %278 : vector<8x32xf32> to vector<1x8x32xf32>
    tpu.vector_store %arg15[%279, %c0_91, %c0_92], %282 {strides = array<i32>} : memref<8x8x32xf32, #tpu.memory_space<vmem>>, vector<1x8x32xf32>,
    %c2_i32_93 = arith.constant 2 : i32
    %283 = arith.index_cast %c2_i32_93 : i32 to index
    %c0_94 = arith.constant 0 : index
    %c0_95 = arith.constant 0 : index
    %284 = vector.load %arg14[%283, %c0_94, %c0_95] : memref<8x8x128xf32, #tpu.memory_space<vmem>>, vector<1x8x128xf32>
    %285 = vector.shape_cast %284 : vector<1x8x128xf32> to vector<8x128xf32>
    %cst_96 = arith.constant dense<0.000000e+00> : vector<8x128xf32>
    %286 = tpu.matmul %278, %222, %cst_96 {dimension_numbers = #tpu.dot_dimension_numbers<[1], [0], [0], [1], [0, 0, 1, 1], [], []>} : vector<8x32xf32>, vector<32x128xf32>, vector<8x128xf32> -> vector<8x128xf32>
    %287 = arith.addf %285, %286 : vector<8x128xf32>
    %288 = math.tanh %287 : vector<8x128xf32>
    %289 = arith.negf %287 : vector<8x128xf32>
    %290 = math.exp %289 : vector<8x128xf32>
    %cst_97 = arith.constant 1.000000e+00 : f32
    %291 = vector.broadcast %cst_97 : f32 to vector<8x128xf32>
    %292 = arith.addf %291, %290 : vector<8x128xf32>
    %293 = arith.divf %291, %292 : vector<8x128xf32>
    %294 = arith.select %5, %288, %293 : vector<8x128xi1>, vector<8x128xf32>
    %295 = vector.extract_strided_slice %294 {offsets = [0, 0], sizes = [8, 32], strides = [1, 1]} : vector<8x128xf32> to vector<8x32xf32>
    %296 = vector.extract_strided_slice %294 {offsets = [0, 32], sizes = [8, 32], strides = [1, 1]} : vector<8x128xf32> to vector<8x32xf32>
    %297 = vector.extract_strided_slice %294 {offsets = [0, 64], sizes = [8, 32], strides = [1, 1]} : vector<8x128xf32> to vector<8x32xf32>
    %298 = vector.extract_strided_slice %294 {offsets = [0, 96], sizes = [8, 32], strides = [1, 1]} : vector<8x128xf32> to vector<8x32xf32>
    %299 = arith.mulf %296, %276 : vector<8x32xf32>
    %300 = arith.mulf %295, %297 : vector<8x32xf32>
    %301 = arith.addf %299, %300 : vector<8x32xf32>
    %302 = math.tanh %301 : vector<8x32xf32>
    %303 = arith.mulf %298, %302 : vector<8x32xf32>
    %304 = arith.index_cast %c2_i32_93 : i32 to index
    %c0_98 = arith.constant 0 : index
    %c0_99 = arith.constant 0 : index
    %305 = vector.load %arg15[%304, %c0_98, %c0_99] : memref<8x8x32xf32, #tpu.memory_space<vmem>>, vector<1x8x32xf32>
    %306 = vector.shape_cast %305 : vector<1x8x32xf32> to vector<8x32xf32>
    %307 = vector.shape_cast %303 : vector<8x32xf32> to vector<1x8x32xf32>
    tpu.vector_store %arg15[%304, %c0_98, %c0_99], %307 {strides = array<i32>} : memref<8x8x32xf32, #tpu.memory_space<vmem>>, vector<1x8x32xf32>,
    %c3_i32_100 = arith.constant 3 : i32
    %308 = arith.index_cast %c3_i32_100 : i32 to index
    %c0_101 = arith.constant 0 : index
    %c0_102 = arith.constant 0 : index
    %309 = vector.load %arg14[%308, %c0_101, %c0_102] : memref<8x8x128xf32, #tpu.memory_space<vmem>>, vector<1x8x128xf32>
    %310 = vector.shape_cast %309 : vector<1x8x128xf32> to vector<8x128xf32>
    %cst_103 = arith.constant dense<0.000000e+00> : vector<8x128xf32>
    %311 = tpu.matmul %303, %222, %cst_103 {dimension_numbers = #tpu.dot_dimension_numbers<[1], [0], [0], [1], [0, 0, 1, 1], [], []>} : vector<8x32xf32>, vector<32x128xf32>, vector<8x128xf32> -> vector<8x128xf32>
    %312 = arith.addf %310, %311 : vector<8x128xf32>
    %313 = math.tanh %312 : vector<8x128xf32>
    %314 = arith.negf %312 : vector<8x128xf32>
    %315 = math.exp %314 : vector<8x128xf32>
    %cst_104 = arith.constant 1.000000e+00 : f32
    %316 = vector.broadcast %cst_104 : f32 to vector<8x128xf32>
    %317 = arith.addf %316, %315 : vector<8x128xf32>
    %318 = arith.divf %316, %317 : vector<8x128xf32>
    %319 = arith.select %5, %313, %318 : vector<8x128xi1>, vector<8x128xf32>
    %320 = vector.extract_strided_slice %319 {offsets = [0, 0], sizes = [8, 32], strides = [1, 1]} : vector<8x128xf32> to vector<8x32xf32>
    %321 = vector.extract_strided_slice %319 {offsets = [0, 32], sizes = [8, 32], strides = [1, 1]} : vector<8x128xf32> to vector<8x32xf32>
    %322 = vector.extract_strided_slice %319 {offsets = [0, 64], sizes = [8, 32], strides = [1, 1]} : vector<8x128xf32> to vector<8x32xf32>
    %323 = vector.extract_strided_slice %319 {offsets = [0, 96], sizes = [8, 32], strides = [1, 1]} : vector<8x128xf32> to vector<8x32xf32>
    %324 = arith.mulf %321, %301 : vector<8x32xf32>
    %325 = arith.mulf %320, %322 : vector<8x32xf32>
    %326 = arith.addf %324, %325 : vector<8x32xf32>
    %327 = math.tanh %326 : vector<8x32xf32>
    %328 = arith.mulf %323, %327 : vector<8x32xf32>
    %329 = arith.index_cast %c3_i32_100 : i32 to index
    %c0_105 = arith.constant 0 : index
    %c0_106 = arith.constant 0 : index
    %330 = vector.load %arg15[%329, %c0_105, %c0_106] : memref<8x8x32xf32, #tpu.memory_space<vmem>>, vector<1x8x32xf32>
    %331 = vector.shape_cast %330 : vector<1x8x32xf32> to vector<8x32xf32>
    %332 = vector.shape_cast %328 : vector<8x32xf32> to vector<1x8x32xf32>
    tpu.vector_store %arg15[%329, %c0_105, %c0_106], %332 {strides = array<i32>} : memref<8x8x32xf32, #tpu.memory_space<vmem>>, vector<1x8x32xf32>,
    %c4_i32_107 = arith.constant 4 : i32
    %333 = arith.index_cast %c4_i32_107 : i32 to index
    %c0_108 = arith.constant 0 : index
    %c0_109 = arith.constant 0 : index
    %334 = vector.load %arg14[%333, %c0_108, %c0_109] : memref<8x8x128xf32, #tpu.memory_space<vmem>>, vector<1x8x128xf32>
    %335 = vector.shape_cast %334 : vector<1x8x128xf32> to vector<8x128xf32>
    %cst_110 = arith.constant dense<0.000000e+00> : vector<8x128xf32>
    %336 = tpu.matmul %328, %222, %cst_110 {dimension_numbers = #tpu.dot_dimension_numbers<[1], [0], [0], [1], [0, 0, 1, 1], [], []>} : vector<8x32xf32>, vector<32x128xf32>, vector<8x128xf32> -> vector<8x128xf32>
    %337 = arith.addf %335, %336 : vector<8x128xf32>
    %338 = math.tanh %337 : vector<8x128xf32>
    %339 = arith.negf %337 : vector<8x128xf32>
    %340 = math.exp %339 : vector<8x128xf32>
    %cst_111 = arith.constant 1.000000e+00 : f32
    %341 = vector.broadcast %cst_111 : f32 to vector<8x128xf32>
    %342 = arith.addf %341, %340 : vector<8x128xf32>
    %343 = arith.divf %341, %342 : vector<8x128xf32>
    %344 = arith.select %5, %338, %343 : vector<8x128xi1>, vector<8x128xf32>
    %345 = vector.extract_strided_slice %344 {offsets = [0, 0], sizes = [8, 32], strides = [1, 1]} : vector<8x128xf32> to vector<8x32xf32>
    %346 = vector.extract_strided_slice %344 {offsets = [0, 32], sizes = [8, 32], strides = [1, 1]} : vector<8x128xf32> to vector<8x32xf32>
    %347 = vector.extract_strided_slice %344 {offsets = [0, 64], sizes = [8, 32], strides = [1, 1]} : vector<8x128xf32> to vector<8x32xf32>
    %348 = vector.extract_strided_slice %344 {offsets = [0, 96], sizes = [8, 32], strides = [1, 1]} : vector<8x128xf32> to vector<8x32xf32>
    %349 = arith.mulf %346, %326 : vector<8x32xf32>
    %350 = arith.mulf %345, %347 : vector<8x32xf32>
    %351 = arith.addf %349, %350 : vector<8x32xf32>
    %352 = math.tanh %351 : vector<8x32xf32>
    %353 = arith.mulf %348, %352 : vector<8x32xf32>
    %354 = arith.index_cast %c4_i32_107 : i32 to index
    %c0_112 = arith.constant 0 : index
    %c0_113 = arith.constant 0 : index
    %355 = vector.load %arg15[%354, %c0_112, %c0_113] : memref<8x8x32xf32, #tpu.memory_space<vmem>>, vector<1x8x32xf32>
    %356 = vector.shape_cast %355 : vector<1x8x32xf32> to vector<8x32xf32>
    %357 = vector.shape_cast %353 : vector<8x32xf32> to vector<1x8x32xf32>
    tpu.vector_store %arg15[%354, %c0_112, %c0_113], %357 {strides = array<i32>} : memref<8x8x32xf32, #tpu.memory_space<vmem>>, vector<1x8x32xf32>,
    %c5_i32_114 = arith.constant 5 : i32
    %358 = arith.index_cast %c5_i32_114 : i32 to index
    %c0_115 = arith.constant 0 : index
    %c0_116 = arith.constant 0 : index
    %359 = vector.load %arg14[%358, %c0_115, %c0_116] : memref<8x8x128xf32, #tpu.memory_space<vmem>>, vector<1x8x128xf32>
    %360 = vector.shape_cast %359 : vector<1x8x128xf32> to vector<8x128xf32>
    %cst_117 = arith.constant dense<0.000000e+00> : vector<8x128xf32>
    %361 = tpu.matmul %353, %222, %cst_117 {dimension_numbers = #tpu.dot_dimension_numbers<[1], [0], [0], [1], [0, 0, 1, 1], [], []>} : vector<8x32xf32>, vector<32x128xf32>, vector<8x128xf32> -> vector<8x128xf32>
    %362 = arith.addf %360, %361 : vector<8x128xf32>
    %363 = math.tanh %362 : vector<8x128xf32>
    %364 = arith.negf %362 : vector<8x128xf32>
    %365 = math.exp %364 : vector<8x128xf32>
    %cst_118 = arith.constant 1.000000e+00 : f32
    %366 = vector.broadcast %cst_118 : f32 to vector<8x128xf32>
    %367 = arith.addf %366, %365 : vector<8x128xf32>
    %368 = arith.divf %366, %367 : vector<8x128xf32>
    %369 = arith.select %5, %363, %368 : vector<8x128xi1>, vector<8x128xf32>
    %370 = vector.extract_strided_slice %369 {offsets = [0, 0], sizes = [8, 32], strides = [1, 1]} : vector<8x128xf32> to vector<8x32xf32>
    %371 = vector.extract_strided_slice %369 {offsets = [0, 32], sizes = [8, 32], strides = [1, 1]} : vector<8x128xf32> to vector<8x32xf32>
    %372 = vector.extract_strided_slice %369 {offsets = [0, 64], sizes = [8, 32], strides = [1, 1]} : vector<8x128xf32> to vector<8x32xf32>
    %373 = vector.extract_strided_slice %369 {offsets = [0, 96], sizes = [8, 32], strides = [1, 1]} : vector<8x128xf32> to vector<8x32xf32>
    %374 = arith.mulf %371, %351 : vector<8x32xf32>
    %375 = arith.mulf %370, %372 : vector<8x32xf32>
    %376 = arith.addf %374, %375 : vector<8x32xf32>
    %377 = math.tanh %376 : vector<8x32xf32>
    %378 = arith.mulf %373, %377 : vector<8x32xf32>
    %379 = arith.index_cast %c5_i32_114 : i32 to index
    %c0_119 = arith.constant 0 : index
    %c0_120 = arith.constant 0 : index
    %380 = vector.load %arg15[%379, %c0_119, %c0_120] : memref<8x8x32xf32, #tpu.memory_space<vmem>>, vector<1x8x32xf32>
    %381 = vector.shape_cast %380 : vector<1x8x32xf32> to vector<8x32xf32>
    %382 = vector.shape_cast %378 : vector<8x32xf32> to vector<1x8x32xf32>
    tpu.vector_store %arg15[%379, %c0_119, %c0_120], %382 {strides = array<i32>} : memref<8x8x32xf32, #tpu.memory_space<vmem>>, vector<1x8x32xf32>,
    %c6_i32_121 = arith.constant 6 : i32
    %383 = arith.index_cast %c6_i32_121 : i32 to index
    %c0_122 = arith.constant 0 : index
    %c0_123 = arith.constant 0 : index
    %384 = vector.load %arg14[%383, %c0_122, %c0_123] : memref<8x8x128xf32, #tpu.memory_space<vmem>>, vector<1x8x128xf32>
    %385 = vector.shape_cast %384 : vector<1x8x128xf32> to vector<8x128xf32>
    %cst_124 = arith.constant dense<0.000000e+00> : vector<8x128xf32>
    %386 = tpu.matmul %378, %222, %cst_124 {dimension_numbers = #tpu.dot_dimension_numbers<[1], [0], [0], [1], [0, 0, 1, 1], [], []>} : vector<8x32xf32>, vector<32x128xf32>, vector<8x128xf32> -> vector<8x128xf32>
    %387 = arith.addf %385, %386 : vector<8x128xf32>
    %388 = math.tanh %387 : vector<8x128xf32>
    %389 = arith.negf %387 : vector<8x128xf32>
    %390 = math.exp %389 : vector<8x128xf32>
    %cst_125 = arith.constant 1.000000e+00 : f32
    %391 = vector.broadcast %cst_125 : f32 to vector<8x128xf32>
    %392 = arith.addf %391, %390 : vector<8x128xf32>
    %393 = arith.divf %391, %392 : vector<8x128xf32>
    %394 = arith.select %5, %388, %393 : vector<8x128xi1>, vector<8x128xf32>
    %395 = vector.extract_strided_slice %394 {offsets = [0, 0], sizes = [8, 32], strides = [1, 1]} : vector<8x128xf32> to vector<8x32xf32>
    %396 = vector.extract_strided_slice %394 {offsets = [0, 32], sizes = [8, 32], strides = [1, 1]} : vector<8x128xf32> to vector<8x32xf32>
    %397 = vector.extract_strided_slice %394 {offsets = [0, 64], sizes = [8, 32], strides = [1, 1]} : vector<8x128xf32> to vector<8x32xf32>
    %398 = vector.extract_strided_slice %394 {offsets = [0, 96], sizes = [8, 32], strides = [1, 1]} : vector<8x128xf32> to vector<8x32xf32>
    %399 = arith.mulf %396, %376 : vector<8x32xf32>
    %400 = arith.mulf %395, %397 : vector<8x32xf32>
    %401 = arith.addf %399, %400 : vector<8x32xf32>
    %402 = math.tanh %401 : vector<8x32xf32>
    %403 = arith.mulf %398, %402 : vector<8x32xf32>
    %404 = arith.index_cast %c6_i32_121 : i32 to index
    %c0_126 = arith.constant 0 : index
    %c0_127 = arith.constant 0 : index
    %405 = vector.load %arg15[%404, %c0_126, %c0_127] : memref<8x8x32xf32, #tpu.memory_space<vmem>>, vector<1x8x32xf32>
    %406 = vector.shape_cast %405 : vector<1x8x32xf32> to vector<8x32xf32>
    %407 = vector.shape_cast %403 : vector<8x32xf32> to vector<1x8x32xf32>
    tpu.vector_store %arg15[%404, %c0_126, %c0_127], %407 {strides = array<i32>} : memref<8x8x32xf32, #tpu.memory_space<vmem>>, vector<1x8x32xf32>,
    %c7_i32_128 = arith.constant 7 : i32
    %408 = arith.index_cast %c7_i32_128 : i32 to index
    %c0_129 = arith.constant 0 : index
    %c0_130 = arith.constant 0 : index
    %409 = vector.load %arg14[%408, %c0_129, %c0_130] : memref<8x8x128xf32, #tpu.memory_space<vmem>>, vector<1x8x128xf32>
    %410 = vector.shape_cast %409 : vector<1x8x128xf32> to vector<8x128xf32>
    %cst_131 = arith.constant dense<0.000000e+00> : vector<8x128xf32>
    %411 = tpu.matmul %403, %222, %cst_131 {dimension_numbers = #tpu.dot_dimension_numbers<[1], [0], [0], [1], [0, 0, 1, 1], [], []>} : vector<8x32xf32>, vector<32x128xf32>, vector<8x128xf32> -> vector<8x128xf32>
    %412 = arith.addf %410, %411 : vector<8x128xf32>
    %413 = math.tanh %412 : vector<8x128xf32>
    %414 = arith.negf %412 : vector<8x128xf32>
    %415 = math.exp %414 : vector<8x128xf32>
    %cst_132 = arith.constant 1.000000e+00 : f32
    %416 = vector.broadcast %cst_132 : f32 to vector<8x128xf32>
    %417 = arith.addf %416, %415 : vector<8x128xf32>
    %418 = arith.divf %416, %417 : vector<8x128xf32>
    %419 = arith.select %5, %413, %418 : vector<8x128xi1>, vector<8x128xf32>
    %420 = vector.extract_strided_slice %419 {offsets = [0, 0], sizes = [8, 32], strides = [1, 1]} : vector<8x128xf32> to vector<8x32xf32>
    %421 = vector.extract_strided_slice %419 {offsets = [0, 32], sizes = [8, 32], strides = [1, 1]} : vector<8x128xf32> to vector<8x32xf32>
    %422 = vector.extract_strided_slice %419 {offsets = [0, 64], sizes = [8, 32], strides = [1, 1]} : vector<8x128xf32> to vector<8x32xf32>
    %423 = vector.extract_strided_slice %419 {offsets = [0, 96], sizes = [8, 32], strides = [1, 1]} : vector<8x128xf32> to vector<8x32xf32>
    %424 = arith.mulf %421, %401 : vector<8x32xf32>
    %425 = arith.mulf %420, %422 : vector<8x32xf32>
    %426 = arith.addf %424, %425 : vector<8x32xf32>
    %427 = math.tanh %426 : vector<8x32xf32>
    %428 = arith.mulf %423, %427 : vector<8x32xf32>
    %429 = arith.index_cast %c7_i32_128 : i32 to index
    %c0_133 = arith.constant 0 : index
    %c0_134 = arith.constant 0 : index
    %430 = vector.load %arg15[%429, %c0_133, %c0_134] : memref<8x8x32xf32, #tpu.memory_space<vmem>>, vector<1x8x32xf32>
    %431 = vector.shape_cast %430 : vector<1x8x32xf32> to vector<8x32xf32>
    %432 = vector.shape_cast %428 : vector<8x32xf32> to vector<1x8x32xf32>
    tpu.vector_store %arg15[%429, %c0_133, %c0_134], %432 {strides = array<i32>} : memref<8x8x32xf32, #tpu.memory_space<vmem>>, vector<1x8x32xf32>,
    %c8_i32_135 = arith.constant 8 : i32
    %c1 = arith.constant 1 : index
    %c0_136 = arith.constant 0 : index
    %c0_137 = arith.constant 0 : index
    %433 = vector.load %arg12[%c1, %c0_136, %c0_137] : memref<2x8x32xf32, #tpu.memory_space<vmem>>, vector<1x8x32xf32>
    %434 = vector.shape_cast %433 : vector<1x8x32xf32> to vector<8x32xf32>
    %435 = vector.shape_cast %428 : vector<8x32xf32> to vector<1x8x32xf32>
    tpu.vector_store %arg12[%c1, %c0_136, %c0_137], %435 {strides = array<i32>} : memref<2x8x32xf32, #tpu.memory_space<vmem>>, vector<1x8x32xf32>,
    %c1_138 = arith.constant 1 : index
    %c0_139 = arith.constant 0 : index
    %c0_140 = arith.constant 0 : index
    %436 = vector.load %arg13[%c1_138, %c0_139, %c0_140] : memref<2x8x32xf32, #tpu.memory_space<vmem>>, vector<1x8x32xf32>
    %437 = vector.shape_cast %436 : vector<1x8x32xf32> to vector<8x32xf32>
    %438 = vector.shape_cast %426 : vector<8x32xf32> to vector<1x8x32xf32>
    tpu.vector_store %arg13[%c1_138, %c0_139, %c0_140], %438 {strides = array<i32>} : memref<2x8x32xf32, #tpu.memory_space<vmem>>, vector<1x8x32xf32>,
    %c0_141 = arith.constant 0 : index
    %c0_142 = arith.constant 0 : index
    %c0_143 = arith.constant 0 : index
    %439 = vector.load %arg15[%c0_141, %c0_142, %c0_143] : memref<8x8x32xf32, #tpu.memory_space<vmem>>, vector<8x8x32xf32>
    %440 = vector.shape_cast %439 : vector<8x8x32xf32> to vector<64x32xf32>
    %c0_144 = arith.constant 0 : index
    %c0_145 = arith.constant 0 : index
    %441 = vector.load %arg7[%c0_144, %c0_145] : memref<32x128xf32, #tpu.memory_space<vmem>>, vector<32x128xf32>
    %cst_146 = arith.constant dense<0.000000e+00> : vector<64x128xf32>
    %442 = tpu.matmul %440, %441, %cst_146 {dimension_numbers = #tpu.dot_dimension_numbers<[1], [0], [0], [1], [0, 0, 1, 1], [], []>} : vector<64x32xf32>, vector<32x128xf32>, vector<64x128xf32> -> vector<64x128xf32>
    %c0_147 = arith.constant 0 : index
    %c0_148 = arith.constant 0 : index
    %443 = vector.load %arg8[%c0_147, %c0_148] : memref<1x128xf32, #tpu.memory_space<vmem>>, vector<1x128xf32>
    %444 = vector.broadcast %443 : vector<1x128xf32> to vector<64x128xf32>
    %445 = arith.addf %442, %444 : vector<64x128xf32>
    %cst_149 = arith.constant 0.000000e+00 : f32
    %446 = vector.broadcast %cst_149 : f32 to vector<64x128xf32>
    %447 = arith.cmpf ogt, %445, %446 : vector<64x128xf32>
    %cst_150 = arith.constant 0.00999999977 : f32
    %448 = vector.broadcast %cst_150 : f32 to vector<64x128xf32>
    %449 = arith.mulf %448, %445 : vector<64x128xf32>
    %450 = arith.select %447, %445, %449 : vector<64x128xi1>, vector<64x128xf32>
    %c0_151 = arith.constant 0 : index
    %c0_152 = arith.constant 0 : index
    %451 = vector.load %arg9[%c0_151, %c0_152] : memref<128x128xf32, #tpu.memory_space<vmem>>, vector<128x128xf32>
    %cst_153 = arith.constant dense<0.000000e+00> : vector<64x128xf32>
    %452 = tpu.matmul %450, %451, %cst_153 {dimension_numbers = #tpu.dot_dimension_numbers<[1], [0], [0], [1], [0, 0, 1, 1], [], []>} : vector<64x128xf32>, vector<128x128xf32>, vector<64x128xf32> -> vector<64x128xf32>
    %c0_154 = arith.constant 0 : index
    %c0_155 = arith.constant 0 : index
    %453 = vector.load %arg10[%c0_154, %c0_155] : memref<1x128xf32, #tpu.memory_space<vmem>>, vector<1x128xf32>
    %454 = vector.broadcast %453 : vector<1x128xf32> to vector<64x128xf32>
    %455 = arith.addf %452, %454 : vector<64x128xf32>
    %456 = vector.shape_cast %455 : vector<64x128xf32> to vector<8x8x128xf32>
    %c0_156 = arith.constant 0 : index
    %c0_157 = arith.constant 0 : index
    %c0_158 = arith.constant 0 : index
    %457 = vector.load %arg11[%c0_156, %c0_157, %c0_158] : memref<8x8x128xf32, #tpu.memory_space<vmem>>, vector<8x8x128xf32>
    tpu.vector_store %arg11[%c0_156, %c0_157, %c0_158], %456 {strides = array<i32>} : memref<8x8x128xf32, #tpu.memory_space<vmem>>, vector<8x8x128xf32>,
    return
  }
}

</mosaic_0001>

<bundles_post_ra>
// kernel: rnn_net_forward.1
= control target key start
LH: loop header
LB: loop body
LE: loop exit
PB: predicated region body
PF: predicated region fallthrough
CT: control target
= control target key end

     0   :  { %19 = vsyncpa [#allocation5], 0  ;;  %s4092_s0 = inlined_call_operand.vmem [shape: f32[64,88], index: 0, kind: input, shape index: {}]   ;;  %s4093_s1 = inlined_call_operand.hbm [shape: f32[88,128], index: 1, kind: input, shape index: {}]   ;;  %s4094_s2 = inlined_call_operand.vmem [shape: f32[32,128], index: 2, kind: input, shape index: {}]   ;;  %s4095_s3 = inlined_call_operand.hbm [shape: f32[32,128], index: 3, kind: input, shape index: {}]   ;;  %s4096_s4 = inlined_call_operand.hbm [shape: f32[32,128], index: 4, kind: input, shape index: {}]   ;;  %s4097_s5 = inlined_call_operand.vmem [shape: f32[1,128], index: 5, kind: input, shape index: {}]   ;;  %s4098_s6 = inlined_call_operand.vmem [shape: f32[1,128], index: 6, kind: input, shape index: {}]   ;;  %s4099_s7 = inlined_call_operand.hbm [shape: f32[32,128], index: 7, kind: input, shape index: {}]   ;;  %s4100_s8 = inlined_call_operand.vmem [shape: f32[1,128], index: 8, kind: input, shape index: {}]   ;;  %s4101_s9 = inlined_call_operand.vmem [shape: f32[128,128], index: 9, kind: input, shape index: {}]   ;;  %s4102_s10 = inlined_call_operand.vmem [shape: f32[1,128], index: 10, kind: input, shape index: {}]   ;;  %s4103_s11 = inlined_call_operand.vmem [shape: f32[8,8,128], index: 11, kind: output, shape index: {0}]   ;;  %s4104_s12 = inlined_call_operand.hbm [shape: f32[2,8,32], index: 12, kind: output, shape index: {1}]   ;;  %s4105_s13 = inlined_call_operand.hbm [shape: f32[2,8,32], index: 13, kind: output, shape index: {2}]  }
   0x1   :  { %20 = vsyncpa [#allocation8], 0 }
   0x2   :  { %21 = vsyncpa [#allocation11], 0 }
   0x3   :  { %22 = vsyncpa [#allocation6], 0 }
   0x4   :  { %23 = vsyncpa [#allocation14], 0  ;;  %s3417_s25 = smov [#allocation7]   ;;  %s3418_s27 = smov [#allocation4]  }
   0x5   :  { %s45_s26 = sshll.u32 %s3417_s25, 4  ;;  %s31_s28 = sshll.u32 %s3418_s27, 4  ;;  %s46_s26 = int_to_ptr.vmem [resolvable:$true] %s45_s26  ;;  %s3501_s28 = int_to_ptr.vmem [resolvable:$true] %s31_s28 }
   0x6   :  { %s3275_s14 = scalar_lea.hbm %s4095_s3, 512 }
   0x7   :  { %p3276_p0 = scmp.ne.s32.totalorder %s4095_s3, %s3275_s14  ;;  %p3279_p1 = scmp.lt.u32.totalorder %s3275_s14, %s4095_s3 }
   0x9   :  { %p3281_p2 = pnand %p3279_p1, %p3276_p0 }
   0xb   :  { %3284 = shalt.err (!%p3281_p2)
}
   0xc   :  { %s3285_s19 = scalar_lea.vmem %s46_s26, 512  ;;  %p3290_p4 = scmp.lt.s32.totalorder %s46_s26, %s46_s26 }
   0xd   :  { %p3286_p3 = scmp.ne.s32.totalorder %s46_s26, %s3285_s19  ;;  %p3291_p5 = scmp.lt.s32.totalorder %s3285_s19, %s3285_s19 }
   0xf   :  { %p3292_p6 = por %p3291_p5, %p3290_p4 }
  0x11   :  { %p3293_p7 = pnand %p3292_p6, %p3286_p3 }
  0x13   :  { %3296 = shalt.err (!%p3293_p7)
}
  0x14   :  { %s3419_s20 = smov 128   ;;  %s3420_s21 = smov 8  }
  0x15   :  { %51 = dma.hbm_to_vmem [thread:$0]  %s4095_s3, 512, %s46_s26, [#allocation8], %s3419_s20, %s3419_s20, %s3420_s21  }
  0x16   :  { %s3297_s27 = scalar_lea.hbm %s4093_s1, 1408 }
  0x17   :  { %p3298_p8 = scmp.ne.s32.totalorder %s4093_s1, %s3297_s27  ;;  %p3301_p9 = scmp.lt.u32.totalorder %s3297_s27, %s4093_s1 }
  0x19   :  { %p3303_p10 = pnand %p3301_p9, %p3298_p8 }
  0x1b   :  { %3306 = shalt.err (!%p3303_p10)
}
  0x1c   :  { %s3307_s16 = scalar_lea.vmem %s3501_s28, 1408  ;;  %p3312_p12 = scmp.lt.s32.totalorder %s3501_s28, %s3501_s28 }
  0x1d   :  { %p3308_p11 = scmp.ne.s32.totalorder %s3501_s28, %s3307_s16  ;;  %p3313_p13 = scmp.lt.s32.totalorder %s3307_s16, %s3307_s16 }
  0x1f   :  { %p3314_p0 = por %p3313_p13, %p3312_p12 }
  0x21   :  { %p3315_p1 = pnand %p3314_p0, %p3308_p11 }
  0x23   :  { %3318 = shalt.err (!%p3315_p1)
}
  0x24   :  { %37 = dma.hbm_to_vmem [thread:$0]  %s4093_s1, 1408, %s3501_s28, [#allocation5], %s3419_s20, %s3419_s20, %s3420_s21  }
  0x25   :  { %s3421_s17 = smov [#allocation9]   ;;  %s3422_s19 = smov [#allocation10]  }
  0x26   :  { %s57_s18 = sshll.u32 %s3421_s17, 4  ;;  %s73_s22 = sshll.u32 %s3422_s19, 4  ;;  %s58_s18 = int_to_ptr.vmem [resolvable:$true] %s57_s18  ;;  %s3538_s22 = int_to_ptr.vmem [resolvable:$true] %s73_s22 }
  0x27   :  { %s3319_s25 = scalar_lea.hbm %s4096_s4, 512 }
  0x28   :  { %p3320_p2 = scmp.ne.s32.totalorder %s4096_s4, %s3319_s25  ;;  %p3323_p3 = scmp.lt.u32.totalorder %s3319_s25, %s4096_s4 }
  0x2a   :  { %p3325_p4 = pnand %p3323_p3, %p3320_p2 }
  0x2c   :  { %3328 = shalt.err (!%p3325_p4)
}
  0x2d   :  { %s3329_s1 = scalar_lea.vmem %s58_s18, 512  ;;  %p3334_p6 = scmp.lt.s32.totalorder %s58_s18, %s58_s18 }
  0x2e   :  { %p3330_p5 = scmp.ne.s32.totalorder %s58_s18, %s3329_s1  ;;  %p3335_p7 = scmp.lt.s32.totalorder %s3329_s1, %s3329_s1 }
  0x30   :  { %p3336_p8 = por %p3335_p7, %p3334_p6 }
  0x32   :  { %p3337_p9 = pnand %p3336_p8, %p3330_p5 }
  0x34   :  { %3340 = shalt.err (!%p3337_p9)
}
  0x35   :  { %63 = dma.hbm_to_vmem [thread:$0]  %s4096_s4, 512, %s58_s18, [#allocation8], %s3419_s20, %s3419_s20, %s3420_s21  }
  0x36   :  { %s3341_s26 = scalar_lea.hbm %s4099_s7, 512 }
  0x37   :  { %p3342_p10 = scmp.ne.s32.totalorder %s4099_s7, %s3341_s26  ;;  %p3345_p11 = scmp.lt.u32.totalorder %s3341_s26, %s4099_s7 }
  0x39   :  { %p3347_p12 = pnand %p3345_p11, %p3342_p10 }
  0x3b   :  { %3350 = shalt.err (!%p3347_p12)
}
  0x3c   :  { %s3351_s25 = scalar_lea.vmem %s3538_s22, 512  ;;  %p3356_p0 = scmp.lt.s32.totalorder %s3538_s22, %s3538_s22 }
  0x3d   :  { %p3352_p13 = scmp.ne.s32.totalorder %s3538_s22, %s3351_s25  ;;  %p3357_p1 = scmp.lt.s32.totalorder %s3351_s25, %s3351_s25 }
  0x3f   :  { %p3358_p2 = por %p3357_p1, %p3356_p0 }
  0x41   :  { %p3359_p3 = pnand %p3358_p2, %p3352_p13 }
  0x43   :  { %3362 = shalt.err (!%p3359_p3)
}
  0x44   :  { %79 = dma.hbm_to_vmem [thread:$0]  %s4099_s7, 512, %s3538_s22, [#allocation11], %s3419_s20, %s3419_s20, %s3420_s21  }
  0x45   :  { %3407 = dma.done.wait [#allocation5], 1408  }
  0x46   :  { %3408 = vsyncadd [#allocation5], 4294965888 }
  0x47   :  { %3409 = dma.done.wait [#allocation8], 1024  }
  0x48   :  { %3410 = vsyncadd [#allocation8], 4294966272 }
  0x49   :  { %3411 = dma.done.wait [#allocation11], 512  }
  0x4a   :  { %3412 = vsyncadd [#allocation11], 4294966784  ;;  %v3423_v0 = vmov 0.0|0.0   ;;  %vm3424_vm0 = vmmov 0   ;;  %v3425_v1 = vmov 0.0   ;;  %v115_v2 = vld [vmem:[#allocation4] sm:$0xff]  ;;  %v98_v54 = vlaneseq }
  0x4b   :  { %3001 = vmatprep.subr.bf16.mxu1 %v3423_v0  ;;  %2739 = vmatprep.mubr.msk.f32.mxu1 %vm3424_vm0, %v3425_v1  ;;  %v116_v3 = vld [vmem:[#allocation4 + $0x8] sm:$0xff]  ;;  %v117_v4 = vld [vmem:[#allocation4 + $0x10] sm:$0xff]  ;;  %v118_v6 = vld [vmem:[#allocation4 + $0x18] sm:$0xff]  ;;  %vm133_vm1 = vcmask 719872   ;;  %s3427_s4 = smov 32   ;;  %vm272_vm5 = vcmask 261120  }
  0x4c   :  { %v2969_v5 = vpack.c.bf16 %v116_v3, %v115_v2  ;;  %v2973_v7 = vpack.c.bf16 %v118_v6, %v117_v4  ;;  %v119_v8 = vld [vmem:[#allocation4 + $0x20] sm:$0xff]  ;;  %v120_v9 = vld [vmem:[#allocation4 + $0x28] sm:$0xff]  ;;  %v103_v11 = vld [vmem:[#allocation7] sm:$0xff]  ;;  %v99_v56 = vand.u32 127, %v98_v54  ;;  %s3428_s16 = smov 96   ;;  %s3430_s3 = smov [#allocation13]  }
  0x4d   :  { %v107_v10 = vld [vmem:[%s4092_s0] sm:$0xff]  ;;  %v2977_v13 = vpack.c.bf16 %v120_v9, %v119_v8  ;;  %v121_v14 = vld [vmem:[#allocation4 + $0x30] sm:$0xff]  ;;  %v122_v16 = vld [vmem:[#allocation4 + $0x38] sm:$0xff]  ;;  %s2450_s26 = sshll.u32 %s3430_s3, 4  ;;  %s4047_s26 = int_to_ptr.vmem [resolvable:$true] %s2450_s26 }
  0x4e   :  { %2970 = vmatprep.subr.bf16.mxu0 %v2969_v5  ;;  %2697 = vmatprep.mubr.msk.f32.mxu0 %vm133_vm1, %v107_v10  ;;  %v104_v12 = vld [vmem:[#allocation7 + $0x8] sm:$0xff]  ;;  %v105_v17 = vld [vmem:[#allocation7 + $0x10] sm:$0xff]  ;;  %v106_v18 = vld [vmem:[#allocation7 + $0x18] sm:$0xff]  ;;  %v2981_v19 = vpack.c.bf16 %v122_v16, %v121_v14  ;;  %vm100_vm2 = vcmp.ge.s32.totalorder %v99_v56, 64  ;;  %vm101_vm3 = vcmp.lt.s32.totalorder %v99_v56, 96 }
  0x4f   :  { %2972 = vmatpush3.bf16.msra.mxu0 %v2969_v5  ;;  %v3582_v15 = vpack.c.bf16 %v104_v12, %v103_v11  ;;  %v3586_v20 = vpack.c.bf16 %v106_v18, %v105_v17  ;;  %v123_v21 = vld [vmem:[#allocation4 + $0x40] sm:$0xff]  ;;  %v124_v22 = vld [vmem:[#allocation4 + $0x48] sm:$0xff]  ;;  %v125_v24 = vld [vmem:[#allocation4 + $0x50] sm:$0xff] }
  0x50   :  { %2974 = vmatprep.subr.bf16.mxu0 %v2973_v7  ;;  %v2985_v23 = vpack.c.bf16 %v124_v22, %v123_v21  ;;  %v108_v25 = vld [vmem:[%s4092_s0 + $0x8] sm:$0xff]  ;;  %v109_v26 = vld [vmem:[%s4092_s0 + $0x10] sm:$0xff]  ;;  %v110_v27 = vld [vmem:[%s4092_s0 + $0x18] sm:$0xff] }
  0x51   :  { %3003 = vmatpush3.bf16.msra.mxu1 %v3582_v15  ;;  %v111_v28 = vld [vmem:[%s4092_s0 + $0x20] sm:$0xff]  ;;  %v112_v29 = vld [vmem:[%s4092_s0 + $0x28] sm:$0xff]  ;;  %v113_v30 = vld [vmem:[%s4092_s0 + $0x30] sm:$0xff] }
  0x52   :  { %3004 = vmatprep.subr.bf16.mxu1 %v3423_v0  ;;  %v114_v31 = vld [vmem:[%s4092_s0 + $0x38] sm:$0xff]  ;;  %v2470_v32 = vld [vmem:[%s4097_s5] ss:$0 sm:$0xff]  ;;  %vm3647_vm4 = vmand %vm100_vm2, %vm101_vm3  ;;  %s3426_s5 = smov 64  }
  0x53   :  { %2976 = vmatpush3.bf16.msra.mxu0 %v2973_v7 }
  0x54   :  { %2978 = vmatprep.subr.bf16.mxu0 %v2977_v13 }
  0x55   :  { %3006 = vmatpush3.bf16.msra.mxu1 %v3586_v20 }
  0x56   :  { %3007 = vmatprep.subr.bf16.mxu1 %v3423_v0 }
  0x57   :  { %2980 = vmatpush3.bf16.msra.mxu0 %v2977_v13 }
  0x58   :  { %2982 = vmatprep.subr.bf16.mxu0 %v2981_v19 }
  0x5b   :  { %2984 = vmatpush3.bf16.msra.mxu0 %v2981_v19 }
  0x5c   :  { %2986 = vmatprep.subr.bf16.mxu0 %v2985_v23 }
  0x5f   :  { %2988 = vmatpush3.bf16.msra.mxu0 %v2985_v23 }
  0x60   :  { %2695 = vmatprep.subr.mxu0 %v125_v24 }
  0x63   :  { %2696 = vmatpush3.msra.mxu0 %v125_v24 }
  0x64   :  { %2698 = vmatmul.mubr.msk.f32.vlgmr.msra.gmra.mrb[0].mxu0 %vm133_vm1, %v108_v25  ;;  %2989 = vmatprep.subr.bf16.mxu0 %v3423_v0 }
  0x65   :  { %2991 = vmatpush3.bf16.msra.mxu0 %v3582_v15  ;;  %2700 = vmatprep.mubr.msk.f32.mxu0 %vm133_vm1, %v109_v26 }
  0x66   :  { %2992 = vmatprep.subr.bf16.mxu0 %v3423_v0 }
  0x68   :  { %2701 = vmatmul.mubr.msk.f32.gmra.mrb[2].mxu0 %vm133_vm1, %v110_v27 }
  0x69   :  { %2703 = vmatprep.mubr.msk.f32.mxu0 %vm133_vm1, %v111_v28  ;;  %2994 = vmatpush3.bf16.msra.mxu0 %v3586_v20 }
  0x6a   :  { %2995 = vmatprep.subr.bf16.mxu0 %v3423_v0 }
  0x6c   :  { %2704 = vmatmul.mubr.msk.f32.gmra.mrb[4].mxu0 %vm133_vm1, %v112_v29 }
  0x6d   :  { %2706 = vmatprep.mubr.msk.f32.mxu0 %vm133_vm1, %v113_v30 }
  0x70   :  { %2707 = vmatmul.mubr.msk.f32.gmra.mrb[6].mxu0 %vm133_vm1, %v114_v31 }
  0x71   :  { %2717 = vmatprep.mubr.msk.f32.mxu0 %vm3424_vm0, %v3425_v1 }
  0x74   :  { %2718 = vmatmul.mubr.f32.vlgmr.msra.gmra.mrb[8].mxu0 %v3425_v1 }
  0x75   :  { %2997 = vmatpush3.bf16.msra.mxu0 %v3582_v15  ;;  %2728 = vmatprep.mubr.msk.f32.mxu0 %vm3424_vm0, %v3425_v1 }
  0x76   :  { %2998 = vmatprep.subr.bf16.mxu0 %v3423_v0 }
  0x79   :  { %3000 = vmatpush3.bf16.msra.mxu0 %v3586_v20 }
  0x7a   :  { %3013 = vmatprep.subr.bf16.mxu0 %v3423_v0 }
 0x137   :  { %v2699_v33 = vpop.f32.mrb[0].mxu0 }
 0x138   :  { %v230_v34 = vadd.f32 %v2699_v33, %v2470_v32  ;;  %v224_v35 = vpop.f32.mrb[1].mxu0 }
 0x139   :  { %v225_v48 = vadd.f32 %v2470_v32, %v224_v35 }
 0x13b   :  { %v2702_v36 = vpop.f32.mrb[2].mxu0 }
 0x13c   :  { %v3635_v37 = vadd.f32 %v2702_v36, %v2470_v32  ;;  %v234_v38 = vpop.f32.mrb[3].mxu0 }
 0x13d   :  { %v3637_v39 = vadd.f32 %v2470_v32, %v234_v38 }
 0x13f   :  { %v2705_v40 = vpop.f32.mrb[4].mxu0 }
 0x140   :  { %v3639_v41 = vadd.f32 %v2705_v40, %v2470_v32  ;;  %v244_v42 = vpop.f32.mrb[5].mxu0 }
 0x141   :  { %v3641_v43 = vadd.f32 %v2470_v32, %v244_v42 }
 0x143   :  { %v2708_v44 = vpop.f32.mrb[6].mxu0 }
 0x144   :  { %v3643_v45 = vadd.f32 %v2708_v44, %v2470_v32  ;;  %v254_v46 = vpop.f32.mrb[7].mxu0 }
 0x145   :  { %v3645_v47 = vadd.f32 %v2470_v32, %v254_v46 }
 0x147   :  { %v342_v49 = vpop.f32.mrb[8].mxu0 }
 0x148   :  { %v346_v50 = vadd.f32 %v342_v49, %v225_v48  ;;  %v2719_v51 = vpop.f32.mrb[9].mxu0 }
 0x14a   :  { %v2479_v52 = vmul.f32 -1.442695, %v346_v50 }
 0x14c   :  { %3147 = vpow2.f32 %v2479_v52 }
 0x14d   :  { %3149 = vtanh.f32 %v346_v50 }
 0x156   :  { %v3148_v53 = vpop.eup %3147 }
 0x157   :  { %v351_v55 = vadd.f32 1.0, %v3148_v53  ;;  %v3150_v58 = vpop.eup %3149 }
 0x159   :  { %3151 = vrcp.f32 %v351_v55 }
 0x163   :  { %v3152_v59 = vpop.eup %3151 }
 0x164   :  { %v354_v60 = vsel %vm3647_vm4, %v3150_v58, %v3152_v59 }
 0x165   :  { %357 = vrot.lane.b32.xlu0 %v354_v60, %s3426_s5  ;;  %v355_v63 = vmul.f32 0.0, %v354_v60 }
 0x1d7   :  { %v358_v61 = vpop.permute.xlu0 %357 }
 0x1d8   :  { %v360_v62 = vmul.f32 %v358_v61, %v354_v60 }
 0x1da   :  { %362 = vrot.lane.b32.xlu0 %v360_v62, %s3427_s4 }
 0x24c   :  { %v363_v2 = vpop.permute.xlu0 %362 }
 0x24d   :  { %v365_v3 = vadd.f32 %v363_v2, %v355_v63 }
 0x24f   :  { %3153 = vtanh.f32 %v365_v3 }
 0x259   :  { %v3154_v4 = vpop.eup %3153 }
 0x25a   :  { %368 = vrot.lane.b32.xlu1 %v3154_v4, %s3426_s5 }
 0x2cc   :  { %v369_v5 = vpop.permute.xlu1 %368 }
 0x2cd   :  { %v371_v6 = vmul.f32 %v369_v5, %v354_v60 }
 0x2cf   :  { %373 = vrot.lane.b32.xlu1 %v371_v6, %s3427_s4 }
 0x341   :  { %v374_v7 = vpop.permute.xlu1 %373 }
 0x342   :  { %376 = vst.msk [vmem:[#allocation3] sm:$0xff] %vm272_vm5, %v374_v7  ;;  %2729 = vmatmul.mubr.msk.f32.vlgmr.msra.gmra.mrb[10].mxu0 %vm272_vm5, %v374_v7 }
 0x343   :  { %3015 = vmatpush3.bf16.msra.mxu0 %v3582_v15  ;;  %2761 = vmatprep.mubr.msk.f32.mxu0 %vm3424_vm0, %v3425_v1 }
 0x344   :  { %3016 = vmatprep.subr.bf16.mxu0 %v3423_v0 }
 0x347   :  { %3018 = vmatpush3.bf16.msra.mxu0 %v3586_v20 }
 0x348   :  { %3025 = vmatprep.subr.bf16.mxu0 %v3423_v0 }
 0x415   :  { %v447_v8 = vpop.f32.mrb[10].mxu0 }
 0x416   :  { %v451_v9 = vadd.f32 %v447_v8, %v230_v34  ;;  %v2730_v10 = vpop.f32.mrb[11].mxu0 }
 0x418   :  { %v2481_v11 = vmul.f32 -1.442695, %v451_v9 }
 0x41a   :  { %3155 = vpow2.f32 %v2481_v11 }
 0x41b   :  { %3157 = vtanh.f32 %v451_v9 }
 0x424   :  { %v3156_v12 = vpop.eup %3155 }
 0x425   :  { %v456_v13 = vadd.f32 1.0, %v3156_v12  ;;  %v3158_v14 = vpop.eup %3157 }
 0x427   :  { %3159 = vrcp.f32 %v456_v13 }
 0x431   :  { %v3160_v16 = vpop.eup %3159 }
 0x432   :  { %v459_v17 = vsel %vm3647_vm4, %v3158_v14, %v3160_v16 }
 0x433   :  { %462 = vrot.lane.b32.xlu0 %v459_v17, %s3426_s5  ;;  %v460_v21 = vmul.f32 %v459_v17, %v365_v3 }
 0x4a5   :  { %v463_v18 = vpop.permute.xlu0 %462 }
 0x4a6   :  { %v465_v19 = vmul.f32 %v463_v18, %v459_v17 }
 0x4a8   :  { %467 = vrot.lane.b32.xlu1 %v465_v19, %s3427_s4 }
 0x51a   :  { %v468_v22 = vpop.permute.xlu1 %467 }
 0x51b   :  { %v470_v23 = vadd.f32 %v468_v22, %v460_v21 }
 0x51d   :  { %3161 = vtanh.f32 %v470_v23 }
 0x527   :  { %v3162_v24 = vpop.eup %3161 }
 0x528   :  { %473 = vrot.lane.b32.xlu0 %v3162_v24, %s3426_s5 }
 0x59a   :  { %v474_v25 = vpop.permute.xlu0 %473 }
 0x59b   :  { %v476_v26 = vmul.f32 %v474_v25, %v459_v17 }
 0x59d   :  { %478 = vrot.lane.b32.xlu1 %v476_v26, %s3427_s4 }
 0x60f   :  { %v479_v27 = vpop.permute.xlu1 %478 }
 0x610   :  { %482 = vst.msk [vmem:[#allocation3 + $0x8] sm:$0xff] %vm272_vm5, %v479_v27  ;;  %2740 = vmatmul.mubr.msk.f32.vlgmr.msra.gmra.mrb[0].mxu1 %vm272_vm5, %v479_v27 }
 0x611   :  { %3009 = vmatpush3.bf16.msra.mxu1 %v3582_v15  ;;  %2750 = vmatprep.mubr.msk.f32.mxu1 %vm3424_vm0, %v3425_v1 }
 0x612   :  { %3010 = vmatprep.subr.bf16.mxu1 %v3423_v0 }
 0x615   :  { %3012 = vmatpush3.bf16.msra.mxu1 %v3586_v20 }
 0x616   :  { %3019 = vmatprep.subr.bf16.mxu1 %v3423_v0 }
 0x6e3   :  { %v553_v28 = vpop.f32.mrb[0].mxu1 }
 0x6e4   :  { %v557_v29 = vadd.f32 %v553_v28, %v3637_v39  ;;  %v2741_v30 = vpop.f32.mrb[1].mxu1 }
 0x6e6   :  { %v2483_v31 = vmul.f32 -1.442695, %v557_v29 }
 0x6e8   :  { %3163 = vpow2.f32 %v2483_v31 }
 0x6e9   :  { %3165 = vtanh.f32 %v557_v29 }
 0x6f2   :  { %v3164_v32 = vpop.eup %3163 }
 0x6f3   :  { %v562_v33 = vadd.f32 1.0, %v3164_v32  ;;  %v3166_v34 = vpop.eup %3165 }
 0x6f5   :  { %3167 = vrcp.f32 %v562_v33 }
 0x6ff   :  { %v3168_v35 = vpop.eup %3167 }
 0x700   :  { %v565_v36 = vsel %vm3647_vm4, %v3166_v34, %v3168_v35 }
 0x701   :  { %568 = vrot.lane.b32.xlu0 %v565_v36, %s3426_s5  ;;  %v566_v42 = vmul.f32 %v565_v36, %v470_v23 }
 0x773   :  { %v569_v38 = vpop.permute.xlu0 %568 }
 0x774   :  { %v571_v40 = vmul.f32 %v569_v38, %v565_v36  ;;  %v1137_v38 = vld [vmem:[%s4094_s2] sm:$0xff] }
 0x776   :  { %573 = vrot.lane.b32.xlu1 %v571_v40, %s3427_s4  ;;  %v1138_v40 = vld [vmem:[%s4094_s2 + $0x8] sm:$0xff] }
 0x7e8   :  { %v574_v39 = vpop.permute.xlu1 %573 }
 0x7e9   :  { %v576_v44 = vadd.f32 %v574_v39, %v566_v42  ;;  %v3037_v42 = vpack.c.bf16 %v1138_v40, %v1137_v38 }
 0x7eb   :  { %3169 = vtanh.f32 %v576_v44 }
 0x7f5   :  { %v3170_v46 = vpop.eup %3169 }
 0x7f6   :  { %579 = vrot.lane.b32.xlu0 %v3170_v46, %s3426_s5 }
 0x868   :  { %v580_v48 = vpop.permute.xlu0 %579 }
 0x869   :  { %v582_v49 = vmul.f32 %v580_v48, %v565_v36  ;;  %v1139_v48 = vld [vmem:[%s4094_s2 + $0x10] sm:$0xff] }
 0x86b   :  { %584 = vrot.lane.b32.xlu1 %v582_v49, %s3427_s4  ;;  %v1140_v49 = vld [vmem:[%s4094_s2 + $0x18] sm:$0xff] }
 0x8dd   :  { %v585_v50 = vpop.permute.xlu1 %584 }
 0x8de   :  { %588 = vst.msk [vmem:[#allocation3 + $0x10] sm:$0xff] %vm272_vm5, %v585_v50  ;;  %2751 = vmatmul.mubr.msk.f32.vlgmr.msra.gmra.mrb[2].mxu1 %vm272_vm5, %v585_v50  ;;  %v3041_v50 = vpack.c.bf16 %v1140_v49, %v1139_v48 }
 0x8df   :  { %3021 = vmatpush3.bf16.msra.mxu1 %v3582_v15  ;;  %2772 = vmatprep.mubr.msk.f32.mxu1 %vm3424_vm0, %v3425_v1 }
 0x8e0   :  { %3022 = vmatprep.subr.bf16.mxu1 %v3423_v0 }
 0x8e3   :  { %3024 = vmatpush3.bf16.msra.mxu1 %v3586_v20 }
 0x8e4   :  { %3031 = vmatprep.subr.bf16.mxu1 %v3423_v0 }
 0x9b1   :  { %v659_v51 = vpop.f32.mrb[2].mxu1 }
 0x9b2   :  { %v663_v52 = vadd.f32 %v659_v51, %v3635_v37  ;;  %v2752_v53 = vpop.f32.mrb[3].mxu1 }
 0x9b3   :  { %v1130_v53 = vld [vmem:[#allocation3 + $0x8] sm:$0xff] }
 0x9b4   :  { %v2485_v54 = vmul.f32 -1.442695, %v663_v52 }
 0x9b6   :  { %3171 = vpow2.f32 %v2485_v54  ;;  %v1131_v54 = vld [vmem:[#allocation3 + $0x10] sm:$0xff] }
 0x9b7   :  { %3173 = vtanh.f32 %v663_v52  ;;  %v1129_v52 = vld [vmem:[#allocation3] sm:$0xff] }
 0x9c0   :  { %v3172_v55 = vpop.eup %3171 }
 0x9c1   :  { %v668_v56 = vadd.f32 1.0, %v3172_v55  ;;  %v3174_v58 = vpop.eup %3173 }
 0x9c3   :  { %3175 = vrcp.f32 %v668_v56 }
 0x9cd   :  { %v3176_v59 = vpop.eup %3175 }
 0x9ce   :  { %v671_v60 = vsel %vm3647_vm4, %v3174_v58, %v3176_v59 }
 0x9cf   :  { %674 = vrot.lane.b32.xlu0 %v671_v60, %s3426_s5  ;;  %v672_v63 = vmul.f32 %v671_v60, %v576_v44 }
 0xa41   :  { %v675_v61 = vpop.permute.xlu0 %674 }
 0xa42   :  { %v677_v62 = vmul.f32 %v675_v61, %v671_v60 }
 0xa44   :  { %679 = vrot.lane.b32.xlu1 %v677_v62, %s3427_s4 }
 0xab6   :  { %v680_v37 = vpop.permute.xlu1 %679 }
 0xab7   :  { %v682_v2 = vadd.f32 %v680_v37, %v672_v63 }
 0xab9   :  { %3177 = vtanh.f32 %v682_v2 }
 0xac3   :  { %v3178_v3 = vpop.eup %3177 }
 0xac4   :  { %685 = vrot.lane.b32.xlu0 %v3178_v3, %s3426_s5 }
 0xb36   :  { %v686_v4 = vpop.permute.xlu0 %685 }
 0xb37   :  { %v688_v5 = vmul.f32 %v686_v4, %v671_v60 }
 0xb39   :  { %690 = vrot.lane.b32.xlu1 %v688_v5, %s3427_s4 }
 0xbab   :  { %v691_v6 = vpop.permute.xlu1 %690 }
 0xbac   :  { %694 = vst.msk [vmem:[#allocation3 + $0x18] sm:$0xff] %vm272_vm5, %v691_v6  ;;  %2762 = vmatmul.mubr.msk.f32.vlgmr.msra.gmra.mrb[12].mxu0 %vm272_vm5, %v691_v6 }
 0xbad   :  { %3027 = vmatpush3.bf16.msra.mxu0 %v3582_v15  ;;  %2783 = vmatprep.mubr.msk.f32.mxu0 %vm3424_vm0, %v3425_v1 }
 0xbae   :  { %3028 = vmatprep.subr.bf16.mxu0 %v3423_v0 }
 0xbb1   :  { %3030 = vmatpush3.bf16.msra.mxu0 %v3586_v20 }
 0xbb2   :  { %3038 = vmatprep.subr.bf16.mxu0 %v3037_v42 }
 0xbb3   :  { %v1132_v55 = vld [vmem:[#allocation3 + $0x18] sm:$0xff] }
 0xc7f   :  { %v765_v7 = vpop.f32.mrb[12].mxu0 }
 0xc80   :  { %v769_v8 = vadd.f32 %v765_v7, %v3641_v43  ;;  %v2763_v9 = vpop.f32.mrb[13].mxu0 }
 0xc82   :  { %v2487_v10 = vmul.f32 -1.442695, %v769_v8 }
 0xc84   :  { %3179 = vpow2.f32 %v2487_v10 }
 0xc85   :  { %3181 = vtanh.f32 %v769_v8 }
 0xc8e   :  { %v3180_v11 = vpop.eup %3179 }
 0xc8f   :  { %v774_v12 = vadd.f32 1.0, %v3180_v11  ;;  %v3182_v13 = vpop.eup %3181 }
 0xc91   :  { %3183 = vrcp.f32 %v774_v12 }
 0xc9b   :  { %v3184_v14 = vpop.eup %3183 }
 0xc9c   :  { %v777_v16 = vsel %vm3647_vm4, %v3182_v13, %v3184_v14 }
 0xc9d   :  { %780 = vrot.lane.b32.xlu0 %v777_v16, %s3426_s5  ;;  %v778_v19 = vmul.f32 %v777_v16, %v682_v2 }
 0xd0f   :  { %v781_v17 = vpop.permute.xlu0 %780 }
 0xd10   :  { %v783_v18 = vmul.f32 %v781_v17, %v777_v16  ;;  %v1125_v17 = vld [vmem:[#allocation9] sm:$0xff] }
 0xd12   :  { %785 = vrot.lane.b32.xlu1 %v783_v18, %s3427_s4  ;;  %v1126_v18 = vld [vmem:[#allocation9 + $0x8] sm:$0xff] }
 0xd84   :  { %v786_v43 = vpop.permute.xlu1 %785 }
 0xd85   :  { %v788_v21 = vadd.f32 %v786_v43, %v778_v19  ;;  %v3770_v19 = vpack.c.bf16 %v1126_v18, %v1125_v17  ;;  %v1127_v43 = vld [vmem:[#allocation9 + $0x10] sm:$0xff] }
 0xd87   :  { %3185 = vtanh.f32 %v788_v21 }
 0xd91   :  { %v3186_v22 = vpop.eup %3185 }
 0xd92   :  { %791 = vrot.lane.b32.xlu0 %v3186_v22, %s3426_s5 }
 0xe04   :  { %v792_v23 = vpop.permute.xlu0 %791 }
 0xe05   :  { %v794_v24 = vmul.f32 %v792_v23, %v777_v16 }
 0xe07   :  { %796 = vrot.lane.b32.xlu1 %v794_v24, %s3427_s4 }
 0xe79   :  { %v797_v25 = vpop.permute.xlu1 %796 }
 0xe7a   :  { %800 = vst.msk [vmem:[#allocation3 + $0x20] sm:$0xff] %vm272_vm5, %v797_v25  ;;  %2773 = vmatmul.mubr.msk.f32.vlgmr.msra.gmra.mrb[4].mxu1 %vm272_vm5, %v797_v25 }
 0xe7b   :  { %3033 = vmatpush3.bf16.msra.mxu1 %v3582_v15  ;;  %2794 = vmatprep.mubr.msk.f32.mxu1 %vm3424_vm0, %v3425_v1 }
 0xe7c   :  { %3034 = vmatprep.subr.bf16.mxu1 %v3423_v0 }
 0xe7f   :  { %3036 = vmatpush3.bf16.msra.mxu1 %v3586_v20 }
 0xe80   :  { %3045 = vmatprep.subr.bf16.mxu1 %v3423_v0 }
 0xe81   :  { %v1133_v56 = vld [vmem:[#allocation3 + $0x20] sm:$0xff] }
 0xf4d   :  { %v871_v26 = vpop.f32.mrb[4].mxu1 }
 0xf4e   :  { %v875_v27 = vadd.f32 %v871_v26, %v3639_v41  ;;  %v2774_v28 = vpop.f32.mrb[5].mxu1 }
 0xf50   :  { %v2489_v29 = vmul.f32 -1.442695, %v875_v27 }
 0xf52   :  { %3187 = vpow2.f32 %v2489_v29 }
 0xf53   :  { %3189 = vtanh.f32 %v875_v27 }
 0xf5c   :  { %v3188_v30 = vpop.eup %3187 }
 0xf5d   :  { %v880_v31 = vadd.f32 1.0, %v3188_v30  ;;  %v3190_v15 = vpop.eup %3189  ;;  %v3799_v30 = vld [vmem:[%s4098_s6] ss:$0 sm:$0xff] }
 0xf5f   :  { %3191 = vrcp.f32 %v880_v31 }
 0xf69   :  { %v3192_v32 = vpop.eup %3191 }
 0xf6a   :  { %v883_v33 = vsel %vm3647_vm4, %v3190_v15, %v3192_v32 }
 0xf6b   :  { %886 = vrot.lane.b32.xlu0 %v883_v33, %s3426_s5  ;;  %v884_v35 = vmul.f32 %v883_v33, %v788_v21  ;;  %v1128_v21 = vld [vmem:[#allocation9 + $0x18] sm:$0xff] }
 0xf6c   :  { %v3774_v22 = vpack.c.bf16 %v1128_v21, %v1127_v43 }
 0xfdd   :  { %v887_v20 = vpop.permute.xlu0 %886 }
 0xfde   :  { %v889_v34 = vmul.f32 %v887_v20, %v883_v33 }
 0xfe0   :  { %891 = vrot.lane.b32.xlu1 %v889_v34, %s3427_s4 }
0x1052   :  { %v892_v41 = vpop.permute.xlu1 %891 }
0x1053   :  { %v894_v36 = vadd.f32 %v892_v41, %v884_v35 }
0x1055   :  { %3193 = vtanh.f32 %v894_v36 }
0x105f   :  { %v3194_v39 = vpop.eup %3193 }
0x1060   :  { %897 = vrot.lane.b32.xlu0 %v3194_v39, %s3426_s5 }
0x10d2   :  { %v898_v44 = vpop.permute.xlu0 %897 }
0x10d3   :  { %v900_v46 = vmul.f32 %v898_v44, %v883_v33 }
0x10d5   :  { %902 = vrot.lane.b32.xlu1 %v900_v46, %s3427_s4 }
0x1147   :  { %v903_v51 = vpop.permute.xlu1 %902 }
0x1148   :  { %906 = vst.msk [vmem:[#allocation3 + $0x28] sm:$0xff] %vm272_vm5, %v903_v51  ;;  %2784 = vmatmul.mubr.msk.f32.vlgmr.msra.gmra.mrb[14].mxu0 %vm272_vm5, %v903_v51 }
0x1149   :  { %3040 = vmatpush3.bf16.msra.mxu0 %v3037_v42  ;;  %2805 = vmatprep.mubr.msk.f32.mxu0 %vm272_vm5, %v1129_v52 }
0x114a   :  { %3042 = vmatprep.subr.bf16.mxu0 %v3041_v50 }
0x114d   :  { %3044 = vmatpush3.bf16.msra.mxu0 %v3041_v50 }
0x114e   :  { %3057 = vmatprep.subr.bf16.mxu0 %v3423_v0 }
0x114f   :  { %v1134_v58 = vld [vmem:[#allocation3 + $0x28] sm:$0xff] }
0x1150   :  { %2806 = vmatmul.mubr.msk.f32.vlgmr.msra.gmra.mrb[16].mxu0 %vm272_vm5, %v1130_v53 }
0x1151   :  { %2808 = vmatprep.mubr.msk.f32.mxu0 %vm272_vm5, %v1131_v54  ;;  %3059 = vmatpush3.bf16.msra.mxu0 %v3770_v19 }
0x1152   :  { %3060 = vmatprep.subr.bf16.mxu0 %v3423_v0 }
0x1154   :  { %2809 = vmatmul.mubr.msk.f32.gmra.mrb[18].mxu0 %vm272_vm5, %v1132_v55 }
0x1155   :  { %2811 = vmatprep.mubr.msk.f32.mxu0 %vm272_vm5, %v1133_v56  ;;  %3062 = vmatpush3.bf16.msra.mxu0 %v3774_v22 }
0x1156   :  { %3069 = vmatprep.subr.bf16.mxu0 %v3423_v0 }
0x1158   :  { %2812 = vmatmul.mubr.msk.f32.gmra.mrb[20].mxu0 %vm272_vm5, %v1134_v58 }
0x121b   :  { %v977_v59 = vpop.f32.mrb[14].mxu0 }
0x121c   :  { %v981_v60 = vadd.f32 %v977_v59, %v3645_v47  ;;  %v2785_v61 = vpop.f32.mrb[15].mxu0 }
0x121e   :  { %v2491_v62 = vmul.f32 -1.442695, %v981_v60 }
0x1220   :  { %3195 = vpow2.f32 %v2491_v62 }
0x1221   :  { %3197 = vtanh.f32 %v981_v60 }
0x1223   :  { %v3752_v63 = vpop.f32.mrb[16].mxu0 }
0x1224   :  { %v1238_v37 = vpop.f32.mrb[17].mxu0 }
0x1225   :  { %v1239_v31 = vadd.f32 %v3799_v30, %v1238_v37 }
0x1227   :  { %v3754_v2 = vpop.f32.mrb[18].mxu0 }
0x1228   :  { %v3756_v3 = vpop.f32.mrb[19].mxu0 }
0x122a   :  { %v3196_v4 = vpop.eup %3195 }
0x122b   :  { %v986_v5 = vadd.f32 1.0, %v3196_v4  ;;  %v3758_v6 = vpop.f32.mrb[20].mxu0  ;;  %v3198_v8 = vpop.eup %3197 }
0x122c   :  { %v3760_v7 = vpop.f32.mrb[21].mxu0 }
0x122d   :  { %3199 = vrcp.f32 %v986_v5 }
0x1237   :  { %v3200_v47 = vpop.eup %3199 }
0x1238   :  { %v989_v9 = vsel %vm3647_vm4, %v3198_v8, %v3200_v47  ;;  %v1244_v8 = vadd.f32 %v3752_v63, %v3799_v30 }
0x1239   :  { %992 = vrot.lane.b32.xlu0 %v989_v9, %s3426_s5  ;;  %v990_v12 = vmul.f32 %v989_v9, %v894_v36 }
0x12ab   :  { %v993_v10 = vpop.permute.xlu0 %992 }
0x12ac   :  { %v995_v11 = vmul.f32 %v993_v10, %v989_v9 }
0x12ae   :  { %997 = vrot.lane.b32.xlu1 %v995_v11, %s3427_s4 }
0x1320   :  { %v998_v13 = vpop.permute.xlu1 %997 }
0x1321   :  { %v3766_v14 = vadd.f32 %v998_v13, %v990_v12 }
0x1323   :  { %3201 = vtanh.f32 %v3766_v14 }
0x132d   :  { %v3202_v16 = vpop.eup %3201 }
0x132e   :  { %1003 = vrot.lane.b32.xlu0 %v3202_v16, %s3426_s5 }
0x13a0   :  { %v1004_v23 = vpop.permute.xlu0 %1003 }
0x13a1   :  { %v1006_v24 = vmul.f32 %v1004_v23, %v989_v9 }
0x13a3   :  { %1008 = vrot.lane.b32.xlu1 %v1006_v24, %s3427_s4 }
0x1415   :  { %v1009_v25 = vpop.permute.xlu1 %1008 }
0x1416   :  { %1012 = vst.msk [vmem:[#allocation3 + $0x30] sm:$0xff] %vm272_vm5, %v1009_v25  ;;  %2795 = vmatmul.mubr.msk.f32.vlgmr.msra.gmra.mrb[6].mxu1 %vm272_vm5, %v1009_v25 }
0x1417   :  { %3047 = vmatpush3.bf16.msra.mxu1 %v3770_v19  ;;  %2825 = vmatprep.mubr.msk.f32.mxu1 %vm3424_vm0, %v3425_v1 }
0x1418   :  { %3048 = vmatprep.subr.bf16.mxu1 %v3423_v0 }
0x141b   :  { %3050 = vmatpush3.bf16.msra.mxu1 %v3774_v22 }
0x141c   :  { %3051 = vmatprep.subr.bf16.mxu1 %v3423_v0 }
0x141d   :  { %v1135_v26 = vld [vmem:[#allocation3 + $0x30] sm:$0xff] }
0x141e   :  { %2826 = vmatmul.mubr.f32.vlgmr.msra.gmra.mrb[8].mxu1 %v3425_v1  ;;  %2814 = vmatprep.mubr.msk.f32.mxu0 %vm272_vm5, %v1135_v26 }
0x141f   :  { %3053 = vmatpush3.bf16.msra.mxu1 %v3770_v19  ;;  %2836 = vmatprep.mubr.msk.f32.mxu1 %vm3424_vm0, %v3425_v1 }
0x1420   :  { %3054 = vmatprep.subr.bf16.mxu1 %v3423_v0 }
0x1423   :  { %3056 = vmatpush3.bf16.msra.mxu1 %v3774_v22 }
0x1424   :  { %3063 = vmatprep.subr.bf16.mxu1 %v3423_v0 }
0x14e9   :  { %v1083_v27 = vpop.f32.mrb[6].mxu1 }
0x14ea   :  { %v1087_v28 = vadd.f32 %v1083_v27, %v3643_v45  ;;  %v2796_v29 = vpop.f32.mrb[7].mxu1 }
0x14ec   :  { %v2493_v42 = vmul.f32 -1.442695, %v1087_v28 }
0x14f1   :  { %v1352_v15 = vpop.f32.mrb[8].mxu1 }
0x14f2   :  { %v1356_v32 = vadd.f32 %v1352_v15, %v1239_v31  ;;  %v2827_v33 = vpop.f32.mrb[9].mxu1 }
0x14f4   :  { %v2503_v20 = vmul.f32 -1.442695, %v1356_v32 }
0x14f6   :  { %3203 = vpow2.f32 %v2503_v20 }
0x14f7   :  { %3205 = vtanh.f32 %v1356_v32  ;;  %v1249_v32 = vadd.f32 %v3799_v30, %v3756_v3 }
0x1500   :  { %v3204_v34 = vpop.eup %3203 }
0x1501   :  { %v1361_v35 = vadd.f32 1.0, %v3204_v34  ;;  %v3206_v41 = vpop.eup %3205 }
0x1503   :  { %3207 = vrcp.f32 %v1361_v35 }
0x1504   :  { %3209 = vpow2.f32 %v2493_v42 }
0x150d   :  { %v3208_v36 = vpop.eup %3207 }
0x150e   :  { %v1364_v45 = vsel %vm3647_vm4, %v3206_v41, %v3208_v36  ;;  %v3210_v39 = vpop.eup %3209 }
0x150f   :  { %1367 = vrot.lane.b32.xlu0 %v1364_v45, %s3426_s5  ;;  %v1365_v44 = vmul.f32 0.0, %v1364_v45  ;;  %v1092_v46 = vadd.f32 1.0, %v3210_v39 }
0x1581   :  { %v1368_v38 = vpop.permute.xlu0 %1367 }
0x1582   :  { %v1370_v40 = vmul.f32 %v1368_v38, %v1364_v45 }
0x1584   :  { %1372 = vrot.lane.b32.xlu1 %v1370_v40, %s3427_s4 }
0x15f6   :  { %v1373_v48 = vpop.permute.xlu1 %1372 }
0x15f7   :  { %v1375_v49 = vadd.f32 %v1373_v48, %v1365_v44 }
0x15f9   :  { %3211 = vtanh.f32 %v1375_v49 }
0x15fa   :  { %3213 = vrcp.f32 %v1092_v46 }
0x15fb   :  { %3215 = vtanh.f32 %v1087_v28 }
0x1603   :  { %v3212_v50 = vpop.eup %3211 }
0x1604   :  { %v3214_v51 = vpop.eup %3213  ;;  %1378 = vrot.lane.b32.xlu0 %v3212_v50, %s3426_s5 }
0x1605   :  { %v3216_v52 = vpop.eup %3215 }
0x1606   :  { %v1095_v53 = vsel %vm3647_vm4, %v3216_v52, %v3214_v51  ;;  %v1254_v52 = vadd.f32 %v3754_v2, %v3799_v30 }
0x1607   :  { %v1096_v60 = vmul.f32 %v1095_v53, %v3766_v14 }
0x1608   :  { %1098 = vrot.lane.b32.xlu0 %v1095_v53, %s3426_s5 }
0x1676   :  { %v1379_v54 = vpop.permute.xlu0 %1378 }
0x1677   :  { %v1381_v55 = vmul.f32 %v1379_v54, %v1364_v45 }
0x1679   :  { %1383 = vrot.lane.b32.xlu1 %v1381_v55, %s3427_s4 }
0x167a   :  { %v1099_v56 = vpop.permute.xlu0 %1098 }
0x167b   :  { %v1101_v58 = vmul.f32 %v1099_v56, %v1095_v53 }
0x167d   :  { %1103 = vrot.lane.b32.xlu0 %v1101_v58, %s3427_s4 }
0x16eb   :  { %v1384_v59 = vpop.permute.xlu1 %1383 }
0x16ec   :  { %1386 = vst.msk [vmem:[#allocation3] sm:$0xff] %vm272_vm5, %v1384_v59  ;;  %2837 = vmatmul.mubr.msk.f32.vlgmr.msra.gmra.mrb[10].mxu1 %vm272_vm5, %v1384_v59 }
0x16ed   :  { %3065 = vmatpush3.bf16.msra.mxu1 %v3770_v19  ;;  %2858 = vmatprep.mubr.msk.f32.mxu1 %vm3424_vm0, %v3425_v1 }
0x16ee   :  { %3066 = vmatprep.subr.bf16.mxu1 %v3423_v0 }
0x16ef   :  { %v1104_v61 = vpop.permute.xlu0 %1103 }
0x16f0   :  { %v3819_v62 = vadd.f32 %v1104_v61, %v1096_v60 }
0x16f1   :  { %3068 = vmatpush3.bf16.msra.mxu1 %v3774_v22 }
0x16f2   :  { %3217 = vtanh.f32 %v3819_v62  ;;  %3075 = vmatprep.subr.bf16.mxu1 %v3423_v0 }
0x16fc   :  { %v3218_v37 = vpop.eup %3217 }
0x16fd   :  { %1109 = vrot.lane.b32.xlu0 %v3218_v37, %s3426_s5 }
0x176f   :  { %v1110_v4 = vpop.permute.xlu0 %1109 }
0x1770   :  { %v1112_v5 = vmul.f32 %v1110_v4, %v1095_v53 }
0x1772   :  { %1114 = vrot.lane.b32.xlu0 %v1112_v5, %s3427_s4 }
0x17bf   :  { %v1456_v47 = vpop.f32.mrb[10].mxu1 }
0x17c0   :  { %v1460_v9 = vadd.f32 %v1456_v47, %v1244_v8  ;;  %v2838_v10 = vpop.f32.mrb[11].mxu1 }
0x17c2   :  { %v2505_v11 = vmul.f32 -1.442695, %v1460_v9 }
0x17c4   :  { %3219 = vpow2.f32 %v2505_v11 }
0x17c5   :  { %3221 = vtanh.f32 %v1460_v9 }
0x17ce   :  { %v3220_v12 = vpop.eup %3219 }
0x17cf   :  { %v1465_v13 = vadd.f32 1.0, %v3220_v12  ;;  %v3222_v14 = vpop.eup %3221 }
0x17d1   :  { %3223 = vrcp.f32 %v1465_v13  ;;  %v1259_v13 = vadd.f32 %v3799_v30, %v3760_v7 }
0x17db   :  { %v3224_v16 = vpop.eup %3223 }
0x17dc   :  { %v1468_v17 = vsel %vm3647_vm4, %v3222_v14, %v3224_v16 }
0x17dd   :  { %1471 = vrot.lane.b32.xlu1 %v1468_v17, %s3426_s5  ;;  %v1469_v25 = vmul.f32 %v1468_v17, %v1375_v49 }
0x17e4   :  { %v1115_v18 = vpop.permute.xlu0 %1114 }
0x17e5   :  { %1118 = vst.msk [vmem:[#allocation3 + $0x38] sm:$0xff] %vm272_vm5, %v1115_v18  ;;  %1119 = vst.msk [vmem:[#allocation12] sm:$0xff] %vm272_vm5, %v1115_v18 }
0x17ec   :  { %v1136_v63 = vld [vmem:[#allocation3 + $0x38] sm:$0xff] }
0x17ed   :  { %2815 = vmatmul.mubr.msk.f32.gmra.mrb[22].mxu0 %vm272_vm5, %v1136_v63 }
0x17ee   :  { %2847 = vmatprep.mubr.msk.f32.mxu0 %vm3424_vm0, %v3425_v1 }
0x184f   :  { %v1472_v43 = vpop.permute.xlu1 %1471 }
0x1850   :  { %v1474_v21 = vmul.f32 %v1472_v43, %v1468_v17 }
0x1852   :  { %1476 = vrot.lane.b32.xlu1 %v1474_v21, %s3427_s4 }
0x18c0   :  { %v3837_v23 = vpop.f32.mrb[22].mxu0 }
0x18c1   :  { %v3839_v24 = vpop.f32.mrb[23].mxu0 }
0x18c4   :  { %v1477_v26 = vpop.permute.xlu1 %1476 }
0x18c5   :  { %v1479_v27 = vadd.f32 %v1477_v26, %v1469_v25 }
0x18c7   :  { %3225 = vtanh.f32 %v1479_v27 }
0x18d1   :  { %v3226_v28 = vpop.eup %3225 }
0x18d2   :  { %1482 = vrot.lane.b32.xlu1 %v3226_v28, %s3426_s5 }
0x1944   :  { %v1483_v29 = vpop.permute.xlu1 %1482 }
0x1945   :  { %v1485_v31 = vmul.f32 %v1483_v29, %v1468_v17 }
0x1947   :  { %1487 = vrot.lane.b32.xlu1 %v1485_v31, %s3427_s4 }
0x19b9   :  { %v1488_v15 = vpop.permute.xlu1 %1487 }
0x19ba   :  { %1490 = vst.msk [vmem:[#allocation3 + $0x8] sm:$0xff] %vm272_vm5, %v1488_v15  ;;  %2848 = vmatmul.mubr.msk.f32.vlgmr.msra.gmra.mrb[24].mxu0 %vm272_vm5, %v1488_v15 }
0x19bb   :  { %3071 = vmatpush3.bf16.msra.mxu0 %v3770_v19  ;;  %2869 = vmatprep.mubr.msk.f32.mxu0 %vm3424_vm0, %v3425_v1 }
0x19bc   :  { %3072 = vmatprep.subr.bf16.mxu0 %v3423_v0 }
0x19bf   :  { %3074 = vmatpush3.bf16.msra.mxu0 %v3774_v22 }
0x19c0   :  { %3081 = vmatprep.subr.bf16.mxu0 %v3423_v0 }
0x1a8d   :  { %v1560_v33 = vpop.f32.mrb[24].mxu0 }
0x1a8e   :  { %v1564_v20 = vadd.f32 %v1560_v33, %v1249_v32  ;;  %v2849_v34 = vpop.f32.mrb[25].mxu0 }
0x1a8f   :  { %v1264_v34 = vadd.f32 %v3758_v6, %v3799_v30 }
0x1a90   :  { %v2507_v35 = vmul.f32 -1.442695, %v1564_v20 }
0x1a92   :  { %3227 = vpow2.f32 %v2507_v35 }
0x1a93   :  { %3229 = vtanh.f32 %v1564_v20 }
0x1a9c   :  { %v3228_v41 = vpop.eup %3227 }
0x1a9d   :  { %v1569_v36 = vadd.f32 1.0, %v3228_v41  ;;  %v3230_v45 = vpop.eup %3229 }
0x1a9f   :  { %3231 = vrcp.f32 %v1569_v36 }
0x1aa9   :  { %v3232_v38 = vpop.eup %3231 }
0x1aaa   :  { %v1572_v40 = vsel %vm3647_vm4, %v3230_v45, %v3232_v38 }
0x1aab   :  { %1575 = vrot.lane.b32.xlu0 %v1572_v40, %s3426_s5  ;;  %v1573_v3 = vmul.f32 %v1572_v40, %v1479_v27 }
0x1b1d   :  { %v1576_v42 = vpop.permute.xlu0 %1575 }
0x1b1e   :  { %v1578_v39 = vmul.f32 %v1576_v42, %v1572_v40 }
0x1b20   :  { %1580 = vrot.lane.b32.xlu1 %v1578_v39, %s3427_s4 }
0x1b92   :  { %v1581_v44 = vpop.permute.xlu1 %1580 }
0x1b93   :  { %v1583_v46 = vadd.f32 %v1581_v44, %v1573_v3  ;;  %v2131_v44 = vld [vmem:[#allocation10] sm:$0xff] }
0x1b95   :  { %3233 = vtanh.f32 %v1583_v46 }
0x1b9f   :  { %v3234_v48 = vpop.eup %3233 }
0x1ba0   :  { %1586 = vrot.lane.b32.xlu0 %v3234_v48, %s3426_s5 }
0x1c12   :  { %v1587_v49 = vpop.permute.xlu0 %1586 }
0x1c13   :  { %v1589_v50 = vmul.f32 %v1587_v49, %v1572_v40 }
0x1c15   :  { %1591 = vrot.lane.b32.xlu1 %v1589_v50, %s3427_s4 }
0x1c87   :  { %v1592_v51 = vpop.permute.xlu1 %1591 }
0x1c88   :  { %1594 = vst.msk [vmem:[#allocation3 + $0x10] sm:$0xff] %vm272_vm5, %v1592_v51  ;;  %2859 = vmatmul.mubr.msk.f32.vlgmr.msra.gmra.mrb[12].mxu1 %vm272_vm5, %v1592_v51 }
0x1c89   :  { %3077 = vmatpush3.bf16.msra.mxu1 %v3770_v19  ;;  %2880 = vmatprep.mubr.msk.f32.mxu1 %vm3424_vm0, %v3425_v1 }
0x1c8a   :  { %3078 = vmatprep.subr.bf16.mxu1 %v3423_v0 }
0x1c8d   :  { %3080 = vmatpush3.bf16.msra.mxu1 %v3774_v22 }
0x1c8e   :  { %3087 = vmatprep.subr.bf16.mxu1 %v3423_v0 }
0x1d5b   :  { %v1664_v53 = vpop.f32.mrb[12].mxu1 }
0x1d5c   :  { %v1668_v54 = vadd.f32 %v1664_v53, %v1254_v52  ;;  %v2860_v55 = vpop.f32.mrb[13].mxu1  ;;  %v2133_v52 = vld [vmem:[#allocation10 + $0x10] sm:$0xff]  ;;  %v2134_v53 = vld [vmem:[#allocation10 + $0x18] sm:$0xff] }
0x1d5e   :  { %v2509_v56 = vmul.f32 -1.442695, %v1668_v54 }
0x1d60   :  { %3235 = vpow2.f32 %v2509_v56  ;;  %v2123_v56 = vld [vmem:[#allocation3] sm:$0xff] }
0x1d61   :  { %3237 = vtanh.f32 %v1668_v54  ;;  %v3097_v54 = vpack.c.bf16 %v2134_v53, %v2133_v52  ;;  %v2309_v53 = vld [vmem:[%s4101_s9 + $0x70] sm:$0xff] }
0x1d6a   :  { %v3236_v58 = vpop.eup %3235 }
0x1d6b   :  { %v1673_v59 = vadd.f32 1.0, %v3236_v58  ;;  %v3238_v60 = vpop.eup %3237  ;;  %v2124_v58 = vld [vmem:[#allocation3 + $0x8] sm:$0xff] }
0x1d6d   :  { %3239 = vrcp.f32 %v1673_v59  ;;  %v2125_v59 = vld [vmem:[#allocation3 + $0x10] sm:$0xff] }
0x1d77   :  { %v3240_v61 = vpop.eup %3239 }
0x1d78   :  { %v1676_v37 = vsel %vm3647_vm4, %v3238_v60, %v3240_v61 }
0x1d79   :  { %1679 = vrot.lane.b32.xlu0 %v1676_v37, %s3426_s5  ;;  %v1677_v2 = vmul.f32 %v1676_v37, %v1583_v46  ;;  %v2132_v46 = vld [vmem:[#allocation10 + $0x8] sm:$0xff] }
0x1d7a   :  { %v3093_v48 = vpack.c.bf16 %v2132_v46, %v2131_v44  ;;  %v2305_v46 = vld [vmem:[%s4101_s9 + $0x50] sm:$0xff] }
0x1deb   :  { %v1680_v4 = vpop.permute.xlu0 %1679 }
0x1dec   :  { %v1682_v5 = vmul.f32 %v1680_v4, %v1676_v37  ;;  %v1269_v4 = vadd.f32 %v3799_v30, %v3839_v24 }
0x1dee   :  { %1684 = vrot.lane.b32.xlu1 %v1682_v5, %s3427_s4 }
0x1e60   :  { %v1685_v8 = vpop.permute.xlu1 %1684 }
0x1e61   :  { %v1687_v47 = vadd.f32 %v1685_v8, %v1677_v2 }
0x1e63   :  { %3241 = vtanh.f32 %v1687_v47 }
0x1e6d   :  { %v3242_v9 = vpop.eup %3241 }
0x1e6e   :  { %1690 = vrot.lane.b32.xlu0 %v3242_v9, %s3426_s5 }
0x1ee0   :  { %v1691_v10 = vpop.permute.xlu0 %1690 }
0x1ee1   :  { %v1693_v11 = vmul.f32 %v1691_v10, %v1676_v37 }
0x1ee3   :  { %1695 = vrot.lane.b32.xlu1 %v1693_v11, %s3427_s4 }
0x1f55   :  { %v1696_v12 = vpop.permute.xlu1 %1695 }
0x1f56   :  { %1698 = vst.msk [vmem:[#allocation3 + $0x18] sm:$0xff] %vm272_vm5, %v1696_v12  ;;  %2870 = vmatmul.mubr.msk.f32.vlgmr.msra.gmra.mrb[26].mxu0 %vm272_vm5, %v1696_v12 }
0x1f57   :  { %3083 = vmatpush3.bf16.msra.mxu0 %v3770_v19  ;;  %2891 = vmatprep.mubr.msk.f32.mxu0 %vm3424_vm0, %v3425_v1 }
0x1f58   :  { %3084 = vmatprep.subr.bf16.mxu0 %v3423_v0 }
0x1f5b   :  { %3086 = vmatpush3.bf16.msra.mxu0 %v3774_v22 }
0x1f5c   :  { %3094 = vmatprep.subr.bf16.mxu0 %v3093_v48 }
0x1f5d   :  { %v2126_v60 = vld [vmem:[#allocation3 + $0x18] sm:$0xff] }
0x2029   :  { %v1768_v14 = vpop.f32.mrb[26].mxu0 }
0x202a   :  { %v1772_v16 = vadd.f32 %v1768_v14, %v1259_v13  ;;  %v2871_v17 = vpop.f32.mrb[27].mxu0 }
0x202c   :  { %v2511_v18 = vmul.f32 -1.442695, %v1772_v16 }
0x202e   :  { %3243 = vpow2.f32 %v2511_v18 }
0x202f   :  { %3245 = vtanh.f32 %v1772_v16 }
0x2038   :  { %v3244_v63 = vpop.eup %3243 }
0x2039   :  { %v1777_v43 = vadd.f32 1.0, %v3244_v63  ;;  %v3246_v21 = vpop.eup %3245 }
0x203b   :  { %3247 = vrcp.f32 %v1777_v43 }
0x2045   :  { %v3248_v25 = vpop.eup %3247 }
0x2046   :  { %v1780_v26 = vsel %vm3647_vm4, %v3246_v21, %v3248_v25 }
0x2047   :  { %1783 = vrot.lane.b32.xlu0 %v1780_v26, %s3426_s5  ;;  %v1781_v7 = vmul.f32 %v1780_v26, %v1687_v47 }
0x20b9   :  { %v1784_v27 = vpop.permute.xlu0 %1783 }
0x20ba   :  { %v1786_v28 = vmul.f32 %v1784_v27, %v1780_v26 }
0x20bc   :  { %1788 = vrot.lane.b32.xlu1 %v1786_v28, %s3427_s4  ;;  %v2295_v28 = vld [vmem:[%s4101_s9] sm:$0xff] }
0x212e   :  { %v1789_v29 = vpop.permute.xlu1 %1788 }
0x212f   :  { %v1791_v31 = vadd.f32 %v1789_v29, %v1781_v7  ;;  %v2296_v7 = vld [vmem:[%s4101_s9 + $0x8] sm:$0xff] }
0x2130   :  { %v3101_v29 = vpack.c.bf16 %v2296_v7, %v2295_v28 }
0x2131   :  { %3249 = vtanh.f32 %v1791_v31 }
0x213b   :  { %v3250_v15 = vpop.eup %3249 }
0x213c   :  { %1794 = vrot.lane.b32.xlu0 %v3250_v15, %s3426_s5 }
0x21ae   :  { %v1795_v32 = vpop.permute.xlu0 %1794 }
0x21af   :  { %v1797_v33 = vmul.f32 %v1795_v32, %v1780_v26 }
0x21b1   :  { %1799 = vrot.lane.b32.xlu1 %v1797_v33, %s3427_s4  ;;  %v3943_v33 = vld [vmem:[%s4100_s8] ss:$0 sm:$0xff] }
0x2223   :  { %v1800_v20 = vpop.permute.xlu1 %1799 }
0x2224   :  { %1802 = vst.msk [vmem:[#allocation3 + $0x20] sm:$0xff] %vm272_vm5, %v1800_v20  ;;  %2881 = vmatmul.mubr.msk.f32.vlgmr.msra.gmra.mrb[14].mxu1 %vm272_vm5, %v1800_v20 }
0x2225   :  { %3089 = vmatpush3.bf16.msra.mxu1 %v3770_v19  ;;  %2902 = vmatprep.mubr.msk.f32.mxu1 %vm3424_vm0, %v3425_v1 }
0x2226   :  { %3090 = vmatprep.subr.bf16.mxu1 %v3423_v0 }
0x2229   :  { %3092 = vmatpush3.bf16.msra.mxu1 %v3774_v22 }
0x222a   :  { %3102 = vmatprep.subr.bf16.mxu1 %v3101_v29 }
0x222b   :  { %v2127_v61 = vld [vmem:[#allocation3 + $0x20] sm:$0xff] }
0x22f7   :  { %v1872_v35 = vpop.f32.mrb[14].mxu1 }
0x22f8   :  { %v1876_v41 = vadd.f32 %v1872_v35, %v1264_v34  ;;  %v2882_v36 = vpop.f32.mrb[15].mxu1  ;;  %v2297_v34 = vld [vmem:[%s4101_s9 + $0x10] sm:$0xff]  ;;  %v2298_v35 = vld [vmem:[%s4101_s9 + $0x18] sm:$0xff] }
0x22f9   :  { %v3105_v36 = vpack.c.bf16 %v2298_v35, %v2297_v34 }
0x22fa   :  { %v2513_v45 = vmul.f32 -1.442695, %v1876_v41 }
0x22fc   :  { %3251 = vpow2.f32 %v2513_v45 }
0x22fd   :  { %3253 = vtanh.f32 %v1876_v41 }
0x2306   :  { %v3252_v38 = vpop.eup %3251 }
0x2307   :  { %v1881_v40 = vadd.f32 1.0, %v3252_v38  ;;  %v3254_v19 = vpop.eup %3253  ;;  %v2299_v38 = vld [vmem:[%s4101_s9 + $0x20] sm:$0xff] }
0x2309   :  { %3255 = vrcp.f32 %v1881_v40  ;;  %v2300_v40 = vld [vmem:[%s4101_s9 + $0x28] sm:$0xff] }
0x2313   :  { %v3256_v42 = vpop.eup %3255 }
0x2314   :  { %v1884_v1 = vsel %vm3647_vm4, %v3254_v19, %v3256_v42  ;;  %v3109_v42 = vpack.c.bf16 %v2300_v40, %v2299_v38 }
0x2315   :  { %1887 = vrot.lane.b32.xlu0 %v1884_v1, %s3426_s5  ;;  %v1885_v6 = vmul.f32 %v1884_v1, %v1791_v31 }
0x2387   :  { %v1888_v0 = vpop.permute.xlu0 %1887 }
0x2388   :  { %v1890_v22 = vmul.f32 %v1888_v0, %v1884_v1  ;;  %v2302_v0 = vld [vmem:[%s4101_s9 + $0x38] sm:$0xff] }
0x238a   :  { %1892 = vrot.lane.b32.xlu1 %v1890_v22, %s3427_s4 }
0x23fc   :  { %v1893_v39 = vpop.permute.xlu1 %1892 }
0x23fd   :  { %v1895_v3 = vadd.f32 %v1893_v39, %v1885_v6  ;;  %v2303_v39 = vld [vmem:[%s4101_s9 + $0x40] sm:$0xff] }
0x23ff   :  { %3257 = vtanh.f32 %v1895_v3 }
0x2409   :  { %v3258_v49 = vpop.eup %3257 }
0x240a   :  { %1898 = vrot.lane.b32.xlu0 %v3258_v49, %s3426_s5 }
0x247c   :  { %v1899_v50 = vpop.permute.xlu0 %1898 }
0x247d   :  { %v1901_v51 = vmul.f32 %v1899_v50, %v1884_v1  ;;  %v2301_v1 = vld [vmem:[%s4101_s9 + $0x30] sm:$0xff]  ;;  %v2307_v50 = vld [vmem:[%s4101_s9 + $0x60] sm:$0xff] }
0x247e   :  { %v3113_v22 = vpack.c.bf16 %v2302_v0, %v2301_v1 }
0x247f   :  { %1903 = vrot.lane.b32.xlu1 %v1901_v51, %s3427_s4  ;;  %v2308_v51 = vld [vmem:[%s4101_s9 + $0x68] sm:$0xff] }
0x2480   :  { %v3125_v52 = vpack.c.bf16 %v2308_v51, %v2307_v50 }
0x24f1   :  { %v1904_v55 = vpop.permute.xlu1 %1903 }
0x24f2   :  { %1906 = vst.msk [vmem:[#allocation3 + $0x28] sm:$0xff] %vm272_vm5, %v1904_v55  ;;  %2892 = vmatmul.mubr.msk.f32.vlgmr.msra.gmra.mrb[28].mxu0 %vm272_vm5, %v1904_v55 }
0x24f3   :  { %3096 = vmatpush3.bf16.msra.mxu0 %v3093_v48  ;;  %2913 = vmatprep.mubr.msk.f32.mxu0 %vm272_vm5, %v2123_v56  ;;  %v2306_v48 = vld [vmem:[%s4101_s9 + $0x58] sm:$0xff] }
0x24f4   :  { %3098 = vmatprep.subr.bf16.mxu0 %v3097_v54  ;;  %v3121_v49 = vpack.c.bf16 %v2306_v48, %v2305_v46 }
0x24f7   :  { %3100 = vmatpush3.bf16.msra.mxu0 %v3097_v54  ;;  %v2310_v54 = vld [vmem:[%s4101_s9 + $0x78] sm:$0xff] }
0x24f8   :  { %v3129_v55 = vpack.c.bf16 %v2310_v54, %v2309_v53 }
0x24f9   :  { %v2128_v37 = vld [vmem:[#allocation3 + $0x28] sm:$0xff] }
0x24fa   :  { %2914 = vmatmul.mubr.msk.f32.vlgmr.msra.gmra.mrb[30].mxu0 %vm272_vm5, %v2124_v58 }
0x24fb   :  { %2916 = vmatprep.mubr.msk.f32.mxu0 %vm272_vm5, %v2125_v59 }
0x24fe   :  { %2917 = vmatmul.mubr.msk.f32.gmra.mrb[32].mxu0 %vm272_vm5, %v2126_v60 }
0x24ff   :  { %2919 = vmatprep.mubr.msk.f32.mxu0 %vm272_vm5, %v2127_v61 }
0x2502   :  { %2920 = vmatmul.mubr.msk.f32.gmra.mrb[34].mxu0 %vm272_vm5, %v2128_v37 }
0x25c5   :  { %v1976_v5 = vpop.f32.mrb[28].mxu0 }
0x25c6   :  { %v1980_v2 = vadd.f32 %v1976_v5, %v1269_v4  ;;  %v2893_v8 = vpop.f32.mrb[29].mxu0 }
0x25c8   :  { %v2515_v47 = vmul.f32 -1.442695, %v1980_v2 }
0x25ca   :  { %3259 = vpow2.f32 %v2515_v47 }
0x25cb   :  { %3261 = vtanh.f32 %v1980_v2 }
0x25cd   :  { %v3915_v9 = vpop.f32.mrb[30].mxu0 }
0x25ce   :  { %v2232_v10 = vpop.f32.mrb[31].mxu0  ;;  %v2238_v56 = vadd.f32 %v3915_v9, %v3943_v33 }
0x25cf   :  { %v2233_v20 = vadd.f32 %v3943_v33, %v2232_v10 }
0x25d0   :  { %v2280_v59 = vmul.f32 0.01, %v2238_v56  ;;  %vm2272_vm7 = vcmp.gt.f32.partialorder %v2238_v56, 0.0 }
0x25d1   :  { %v3917_v11 = vpop.f32.mrb[32].mxu0  ;;  %v2279_v41 = vmul.f32 0.01, %v2233_v20  ;;  %vm2271_vm6 = vcmp.gt.f32.partialorder %v2233_v20, 0.0 }
0x25d2   :  { %v3919_v12 = vpop.f32.mrb[33].mxu0  ;;  %v2248_v60 = vadd.f32 %v3917_v11, %v3943_v33  ;;  %v2288_v2 = vsel %vm2272_vm7, %v2238_v56, %v2280_v59 }
0x25d3   :  { %v2287_v19 = vsel %vm2271_vm6, %v2233_v20, %v2279_v41  ;;  %v2243_v58 = vadd.f32 %v3943_v33, %v3919_v12 }
0x25d4   :  { %v3260_v13 = vpop.eup %3259  ;;  %v2282_v4 = vmul.f32 0.01, %v2248_v60  ;;  %vm2274_vm9 = vcmp.gt.f32.partialorder %v2248_v60, 0.0 }
0x25d5   :  { %v1985_v14 = vadd.f32 1.0, %v3260_v13  ;;  %v3921_v16 = vpop.f32.mrb[34].mxu0  ;;  %v3262_v24 = vpop.eup %3261  ;;  %v2281_v61 = vmul.f32 0.01, %v2243_v58  ;;  %vm2273_vm8 = vcmp.gt.f32.partialorder %v2243_v58, 0.0  ;;  %v1274_v13 = vadd.f32 %v3837_v23, %v3799_v30 }
0x25d6   :  { %v3923_v17 = vpop.f32.mrb[35].mxu0  ;;  %v2258_v5 = vadd.f32 %v3921_v16, %v3943_v33  ;;  %v2290_v10 = vsel %vm2274_vm9, %v2248_v60, %v2282_v4  ;;  %v4009_v30 = vld [vmem:[%s4102_s10] ss:$0 sm:$0xff] }
0x25d7   :  { %3263 = vrcp.f32 %v1985_v14  ;;  %v2253_v37 = vadd.f32 %v3943_v33, %v3923_v17  ;;  %v2289_v47 = vsel %vm2273_vm8, %v2243_v58, %v2281_v61 }
0x25d8   :  { %v2284_v9 = vmul.f32 0.01, %v2258_v5  ;;  %vm2276_vm11 = vcmp.gt.f32.partialorder %v2258_v5, 0.0 }
0x25d9   :  { %v2283_v8 = vmul.f32 0.01, %v2253_v37  ;;  %vm2275_vm10 = vcmp.gt.f32.partialorder %v2253_v37, 0.0 }
0x25da   :  { %v2292_v12 = vsel %vm2276_vm11, %v2258_v5, %v2284_v9 }
0x25db   :  { %v2291_v11 = vsel %vm2275_vm10, %v2253_v37, %v2283_v8 }
0x25e1   :  { %v3264_v18 = vpop.eup %3263 }
0x25e2   :  { %v1988_v63 = vsel %vm3647_vm4, %v3262_v24, %v3264_v18 }
0x25e3   :  { %1991 = vrot.lane.b32.xlu0 %v1988_v63, %s3426_s5  ;;  %v1989_v25 = vmul.f32 %v1988_v63, %v1895_v3  ;;  %v2304_v3 = vld [vmem:[%s4101_s9 + $0x48] sm:$0xff] }
0x25e4   :  { %v3117_v44 = vpack.c.bf16 %v2304_v3, %v2303_v39 }
0x2655   :  { %v1992_v43 = vpop.permute.xlu0 %1991 }
0x2656   :  { %v1994_v21 = vmul.f32 %v1992_v43, %v1988_v63 }
0x2658   :  { %1996 = vrot.lane.b32.xlu1 %v1994_v21, %s3427_s4 }
0x26ca   :  { %v1997_v26 = vpop.permute.xlu1 %1996 }
0x26cb   :  { %v3929_v27 = vadd.f32 %v1997_v26, %v1989_v25 }
0x26cd   :  { %3265 = vtanh.f32 %v3929_v27 }
0x26d7   :  { %v3266_v31 = vpop.eup %3265 }
0x26d8   :  { %2002 = vrot.lane.b32.xlu0 %v3266_v31, %s3426_s5 }
0x274a   :  { %v2003_v15 = vpop.permute.xlu0 %2002 }
0x274b   :  { %v2005_v32 = vmul.f32 %v2003_v15, %v1988_v63 }
0x274d   :  { %2007 = vrot.lane.b32.xlu1 %v2005_v32, %s3427_s4 }
0x27bf   :  { %v2008_v45 = vpop.permute.xlu1 %2007 }
0x27c0   :  { %2010 = vst.msk [vmem:[#allocation3 + $0x30] sm:$0xff] %vm272_vm5, %v2008_v45  ;;  %2903 = vmatmul.mubr.msk.f32.vlgmr.msra.gmra.mrb[16].mxu1 %vm272_vm5, %v2008_v45 }
0x27c1   :  { %3104 = vmatpush3.bf16.msra.mxu1 %v3101_v29  ;;  %2957 = vmatprep.mubr.f32.mxu1 %v2287_v19 }
0x27c2   :  { %3106 = vmatprep.subr.bf16.mxu1 %v3105_v36 }
0x27c5   :  { %3108 = vmatpush3.bf16.msra.mxu1 %v3105_v36 }
0x27c6   :  { %3110 = vmatprep.subr.bf16.mxu1 %v3109_v42 }
0x27c7   :  { %v2129_v6 = vld [vmem:[#allocation3 + $0x30] sm:$0xff] }
0x27c8   :  { %2922 = vmatprep.mubr.msk.f32.mxu0 %vm272_vm5, %v2129_v6 }
0x27c9   :  { %3112 = vmatpush3.bf16.msra.mxu1 %v3109_v42 }
0x27ca   :  { %3114 = vmatprep.subr.bf16.mxu1 %v3113_v22 }
0x27cd   :  { %3116 = vmatpush3.bf16.msra.mxu1 %v3113_v22 }
0x27ce   :  { %3118 = vmatprep.subr.bf16.mxu1 %v3117_v44 }
0x27d1   :  { %3120 = vmatpush3.bf16.msra.mxu1 %v3117_v44 }
0x27d2   :  { %3122 = vmatprep.subr.bf16.mxu1 %v3121_v49 }
0x27d5   :  { %3124 = vmatpush3.bf16.msra.mxu1 %v3121_v49 }
0x27d6   :  { %3126 = vmatprep.subr.bf16.mxu1 %v3125_v52 }
0x27d9   :  { %3128 = vmatpush3.bf16.msra.mxu1 %v3125_v52 }
0x27da   :  { %3130 = vmatprep.subr.bf16.mxu1 %v3129_v55 }
0x27dd   :  { %3132 = vmatpush3.bf16.msra.mxu1 %v3129_v55 }
0x27e0   :  { %2958 = vmatmul.mubr.f32.vlgmr.msra.gmra.mrb[18].mxu1 %v2288_v2 }
0x27e1   :  { %2960 = vmatprep.mubr.f32.mxu1 %v2289_v47 }
0x27e4   :  { %2961 = vmatmul.mubr.f32.gmra.mrb[20].mxu1 %v2290_v10 }
0x27e5   :  { %2963 = vmatprep.mubr.f32.mxu1 %v2291_v11 }
0x27e8   :  { %2964 = vmatmul.mubr.f32.gmra.mrb[22].mxu1 %v2292_v12 }
0x2893   :  { %v2080_v14 = vpop.f32.mrb[16].mxu1 }
0x2894   :  { %v2084_v16 = vadd.f32 %v2080_v14, %v1274_v13  ;;  %v2904_v17 = vpop.f32.mrb[17].mxu1 }
0x2896   :  { %v2517_v24 = vmul.f32 -1.442695, %v2084_v16 }
0x2898   :  { %3267 = vpow2.f32 %v2517_v24 }
0x2899   :  { %3269 = vtanh.f32 %v2084_v16 }
0x28a2   :  { %v3268_v18 = vpop.eup %3267 }
0x28a3   :  { %v2089_v63 = vadd.f32 1.0, %v3268_v18  ;;  %v3270_v43 = vpop.eup %3269 }
0x28a5   :  { %3271 = vrcp.f32 %v2089_v63 }
0x28af   :  { %v3272_v21 = vpop.eup %3271 }
0x28b0   :  { %v2092_v25 = vsel %vm3647_vm4, %v3270_v43, %v3272_v21 }
0x28b1   :  { %2095 = vrot.lane.b32.xlu0 %v2092_v25, %s3426_s5  ;;  %v2093_v45 = vmul.f32 %v2092_v25, %v3929_v27 }
0x28b3   :  { %v2959_v23 = vpop.f32.mrb[18].mxu1 }
0x28b4   :  { %v2390_v26 = vadd.f32 %v2959_v23, %v4009_v30  ;;  %v2384_v28 = vpop.f32.mrb[19].mxu1 }
0x28b5   :  { %v2385_v7 = vadd.f32 %v4009_v30, %v2384_v28 }
0x28b6   :  { %2424 = vst [vmem:[%s4103_s11 + $0x8] sm:$0xff] %v2390_v26 }
0x28b7   :  { %2423 = vst [vmem:[%s4103_s11] sm:$0xff] %v2385_v7  ;;  %v2962_v57 = vpop.f32.mrb[20].mxu1 }
0x28b8   :  { %v2400_v29 = vadd.f32 %v2962_v57, %v4009_v30  ;;  %v2394_v31 = vpop.f32.mrb[21].mxu1 }
0x28b9   :  { %v2395_v15 = vadd.f32 %v4009_v30, %v2394_v31 }
0x28ba   :  { %2426 = vst [vmem:[%s4103_s11 + $0x18] sm:$0xff] %v2400_v29 }
0x28bb   :  { %2425 = vst [vmem:[%s4103_s11 + $0x10] sm:$0xff] %v2395_v15  ;;  %v2965_v32 = vpop.f32.mrb[22].mxu1 }
0x28bc   :  { %v2410_v20 = vadd.f32 %v2965_v32, %v4009_v30  ;;  %v2404_v34 = vpop.f32.mrb[23].mxu1 }
0x28bd   :  { %v2405_v35 = vadd.f32 %v4009_v30, %v2404_v34 }
0x28be   :  { %2428 = vst [vmem:[%s4103_s11 + $0x28] sm:$0xff] %v2410_v20 }
0x28bf   :  { %2427 = vst [vmem:[%s4103_s11 + $0x20] sm:$0xff] %v2405_v35 }
0x2923   :  { %v2096_v41 = vpop.permute.xlu0 %2095 }
0x2924   :  { %v2098_v36 = vmul.f32 %v2096_v41, %v2092_v25 }
0x2926   :  { %2100 = vrot.lane.b32.xlu1 %v2098_v36, %s3427_s4 }
0x2998   :  { %v2101_v38 = vpop.permute.xlu1 %2100 }
0x2999   :  { %v2103_v40 = vadd.f32 %v2101_v38, %v2093_v45 }
0x299b   :  { %3273 = vtanh.f32 %v2103_v40 }
0x29a5   :  { %v3274_v19 = vpop.eup %3273 }
0x29a6   :  { %2106 = vrot.lane.b32.xlu0 %v3274_v19, %s3426_s5  ;;  %s3429_s5 = smov [#allocation12]  }
0x29aa   :  { %1121 = vrot.lane.b32.xlu0 %v3819_v62, %s3428_s16 }
0x2a18   :  { %v2107_v42 = vpop.permute.xlu0 %2106 }
0x2a19   :  { %v2109_v1 = vmul.f32 %v2107_v42, %v2092_v25 }
0x2a1b   :  { %2111 = vrot.lane.b32.xlu1 %v2109_v1, %s3427_s4  ;;  %s2438_s4 = sshll.u32 %s3429_s5, 4  ;;  %s2439_s4 = int_to_ptr.vmem [resolvable:$true] %s2438_s4 }
0x2a1c   :  { %v1122_v0 = vpop.permute.xlu0 %1121  ;;  %s3363_s17 = scalar_lea.vmem %s2439_s4, 256  ;;  %p3368_p5 = scmp.lt.s32.totalorder %s2439_s4, %s2439_s4 }
0x2a1d   :  { %1124 = vst.msk [vmem:[#allocation13] sm:$0xff] %vm272_vm5, %v1122_v0  ;;  %p3364_p4 = scmp.ne.s32.totalorder %s2439_s4, %s3363_s17  ;;  %p3369_p6 = scmp.lt.s32.totalorder %s3363_s17, %s3363_s17 }
0x2a1f   :  { %2118 = vrot.lane.b32.xlu1 %v2103_v40, %s3428_s16  ;;  %p3370_p7 = por %p3369_p6, %p3368_p5 }
0x2a21   :  { %p3371_p8 = pnand %p3370_p7, %p3364_p4 }
0x2a8d   :  { %v2112_v22 = vpop.permute.xlu1 %2111 }
0x2a8e   :  { %2114 = vst.msk [vmem:[#allocation3 + $0x38] sm:$0xff] %vm272_vm5, %v2112_v22  ;;  %2116 = vst.msk [vmem:[#allocation12 + $0x8] sm:$0xff] %vm272_vm5, %v2112_v22 }
0x2a91   :  { %v2119_v27 = vpop.permute.xlu1 %2118 }
0x2a92   :  { %2122 = vst.msk [vmem:[#allocation13 + $0x8] sm:$0xff] %vm272_vm5, %v2119_v27 }
0x2a95   :  { %v2130_v6 = vld [vmem:[#allocation3 + $0x38] sm:$0xff] }
0x2a96   :  { %2923 = vmatmul.mubr.msk.f32.gmra.mrb[36].mxu0 %vm272_vm5, %v2130_v6 }
0x2b69   :  { %v2924_v62 = vpop.f32.mrb[36].mxu0 }
0x2b6a   :  { %v2268_v39 = vadd.f32 %v2924_v62, %v3943_v33  ;;  %v2262_v3 = vpop.f32.mrb[37].mxu0 }
0x2b6b   :  { %v2263_v44 = vadd.f32 %v3943_v33, %v2262_v3 }
0x2b6c   :  { %v2286_v46 = vmul.f32 0.01, %v2268_v39  ;;  %vm2278_vm13 = vcmp.gt.f32.partialorder %v2268_v39, 0.0 }
0x2b6d   :  { %v2285_v48 = vmul.f32 0.01, %v2263_v44  ;;  %vm2277_vm12 = vcmp.gt.f32.partialorder %v2263_v44, 0.0 }
0x2b6e   :  { %v2294_v50 = vsel %vm2278_vm13, %v2268_v39, %v2286_v46 }
0x2b6f   :  { %v2293_v49 = vsel %vm2277_vm12, %v2263_v44, %v2285_v48 }
0x2b70   :  { %2966 = vmatprep.mubr.f32.mxu1 %v2293_v49 }
0x2b71   :  { %2967 = vmatmul.mubr.f32.gmra.mrb[24].mxu1 %v2294_v50 }
0x2b72   :  { %3374 = shalt.err (!%p3371_p8)
}
0x2b73   :  { %s3375_s24 = scalar_lea.hbm %s4104_s12, 256 }
0x2b74   :  { %p3376_p9 = scmp.ne.s32.totalorder %s4104_s12, %s3375_s24  ;;  %p3379_p10 = scmp.lt.u32.totalorder %s3375_s24, %s4104_s12 }
0x2b76   :  { %p3381_p11 = pnand %p3379_p10, %p3376_p9 }
0x2b78   :  { %3384 = shalt.err (!%p3381_p11)
}
0x2b79   :  { %2444 = dma.vmem_to_hbm [thread:$0]  %s2439_s4, 256, %s4104_s12, [#allocation6], %s3419_s20, %s3419_s20, %s3420_s21  }
0x2b7a   :  { %s3385_s22 = scalar_lea.vmem %s4047_s26, 256  ;;  %p3390_p13 = scmp.lt.s32.totalorder %s4047_s26, %s4047_s26 }
0x2b7b   :  { %p3386_p12 = scmp.ne.s32.totalorder %s4047_s26, %s3385_s22  ;;  %p3391_p0 = scmp.lt.s32.totalorder %s3385_s22, %s3385_s22 }
0x2b7d   :  { %p3392_p1 = por %p3391_p0, %p3390_p13 }
0x2b7f   :  { %p3393_p2 = pnand %p3392_p1, %p3386_p12 }
0x2b81   :  { %3396 = shalt.err (!%p3393_p2)
}
0x2b82   :  { %s3397_s10 = scalar_lea.hbm %s4105_s13, 256 }
0x2b83   :  { %p3398_p3 = scmp.ne.s32.totalorder %s4105_s13, %s3397_s10  ;;  %p3401_p4 = scmp.lt.u32.totalorder %s3397_s10, %s4105_s13 }
0x2b85   :  { %p3403_p5 = pnand %p3401_p4, %p3398_p3 }
0x2b87   :  { %3406 = shalt.err (!%p3403_p5)
}
0x2b88   :  { %2456 = dma.vmem_to_hbm [thread:$0]  %s4047_s26, 256, %s4105_s13, [#allocation14], %s3419_s20, %s3419_s20, %s3420_s21  }
0x2c44   :  { %v2968_v33 = vpop.f32.mrb[24].mxu1 }
0x2c45   :  { %v2420_v51 = vadd.f32 %v2968_v33, %v4009_v30  ;;  %v2414_v52 = vpop.f32.mrb[25].mxu1 }
0x2c46   :  { %v2415_v53 = vadd.f32 %v4009_v30, %v2414_v52 }
0x2c47   :  { %2430 = vst [vmem:[%s4103_s11 + $0x38] sm:$0xff] %v2420_v51 }
0x2c48   :  { %2429 = vst [vmem:[%s4103_s11 + $0x30] sm:$0xff] %v2415_v53 }
0x2c49   :  { %3413 = dma.done.wait [#allocation6], 256  }
0x2c4a   :  { %3414 = vsyncadd [#allocation6], 4294967040 }
0x2c4b   :  { %3415 = dma.done.wait [#allocation14], 256  }
0x2c4c   :  { %3416 = vsyncadd [#allocation14], 4294967040 }
0x2c4d   :  { %2465 = vsyncpa [#allocation5], 1 }
0x2c4e   :  { %2466 = vsyncpa [#allocation8], 1 }
0x2c4f   :  { %2467 = vsyncpa [#allocation11], 1 }
0x2c50   :  { %2468 = vsyncpa [#allocation6], 1 }
0x2c51   :  { %2469 = vsyncpa [#allocation14], 1 }

</bundles_post_ra>
